<compile_context>
chip_gen: v6e
topology: v6e:2x2x1
jax: 0.10.0
libtpu: 0.0.40
codegen_flags: <defaults>
</compile_context>

<pallas_src>
import math
from functools import partial

import jax
import jax.numpy as jnp
from jax.experimental import pallas as pl
from jax.experimental.pallas import tpu as pltpu


def _erf(x):
    # Abramowitz & Stegun 7.1.26 rational approximation (|err| < 1.5e-7), built only from
    # ops guaranteed to lower in Mosaic (exp / mul / add / where). exp goes to the EUP.
    a1, a2, a3, a4, a5 = 0.254829592, -0.284496736, 1.421413741, -1.453152027, 1.061405429
    p = 0.3275911
    sgn = jnp.where(x >= 0.0, 1.0, -1.0)
    ax = jnp.abs(x)
    t = 1.0 / (1.0 + p * ax)
    poly = ((((a5 * t + a4) * t + a3) * t + a2) * t + a1) * t
    return sgn * (1.0 - poly * jnp.exp(-ax * ax))


def _layernorm(x, g, b, eps=1e-5):
    mu = jnp.mean(x, axis=-1, keepdims=True)
    var = jnp.mean((x - mu) ** 2, axis=-1, keepdims=True)
    return (x - mu) * jax.lax.rsqrt(var + eps) * g + b


def _rab_kernel(n_head,
                q_ref, k_ref, v_ref, mask_ref,
                lnq_g, lnq_b, lnk_g, lnk_b, lnv_g, lnv_b, ln_g, ln_b,
                wq_h, bq_h, wk_h, bk_h, wv_h, bv_h,
                wo_h, b_out, w1, b1, w2, b2,
                o_ref):
    H = n_head
    Sq = q_ref.shape[1]
    Skv = k_ref.shape[1]
    D = q_ref.shape[-1]
    bf16 = jnp.bfloat16

    # Residual stream and pre-LayerNorms (f32 math, bf16 matmul operands).
    x0 = q_ref[0]                                            # (Sq, D) f32
    qn = _layernorm(x0, lnq_g[...], lnq_b[...]).astype(bf16)
    kn = _layernorm(k_ref[0], lnk_g[...], lnk_b[...]).astype(bf16)
    vn = _layernorm(v_ref[0], lnv_g[...], lnv_b[...]).astype(bf16)

    # Head-batched projections: one dot_general per tensor, producing (H, S, Dh)
    # directly (no in-kernel transpose). 1/sqrt(Dh) already folded into wq/bq on host.
    def proj(xn_b, w_ref, b_ref, S):
        xb = jnp.broadcast_to(xn_b[None, :, :], (H, S, D))
        y = jax.lax.dot_general(xb, w_ref[...],
                                (((2,), (1,)), ((0,), (0,))),
                                preferred_element_type=jnp.float32)
        return y + b_ref[...]

    qh = proj(qn, wq_h, bq_h, Sq)                            # (H, Sq, Dh) f32 (pre-scaled)
    kh = proj(kn, wk_h, bk_h, Skv)                           # (H, Skv, Dh) f32
    vh = proj(vn, wv_h, bv_h, Skv).astype(bf16)              # (H, Skv, Dh) bf16

    # Attention scores + softmax (f32), batched over heads on the MXU.
    s = jnp.einsum('hqd,hkd->hqk', qh.astype(bf16), kh.astype(bf16),
                   preferred_element_type=jnp.float32)       # (H, Sq, Skv)
    s = s + mask_ref[...]                                    # (1,1,Skv) additive mask
    s = s - jnp.max(s, axis=-1, keepdims=True)
    p = jnp.exp(s)
    inv = pl.reciprocal(jnp.sum(p, axis=-1, keepdims=True), approx=True)

    o = jnp.einsum('hqk,hkd->hqd', p.astype(bf16), vh,
                   preferred_element_type=jnp.float32)       # (H, Sq, Dh)
    o = (o * inv).astype(bf16)                               # normalize on the smaller tensor

    # Output projection: per-head partial products summed over heads (avoids a
    # head -> lane relayout / concatenate).
    op = jax.lax.dot_general(o, wo_h[...],
                             (((2,), (1,)), ((0,), (0,))),
                             preferred_element_type=jnp.float32)  # (H, Sq, D)
    attn = jnp.sum(op, axis=0) + b_out[...]
    x1 = x0 + attn                                           # first residual (f32)

    # MLP with exact (erf) GELU; matmuls in bf16, pointwise math in f32.
    xn = _layernorm(x1, ln_g[...], ln_b[...]).astype(bf16)
    h1 = jnp.dot(xn, w1[...], preferred_element_type=jnp.float32) + b1[...]
    h1 = 0.5 * h1 * (1.0 + _erf(h1 * (1.0 / math.sqrt(2.0))))
    y = jnp.dot(h1.astype(bf16), w2[...], preferred_element_type=jnp.float32) + b2[...]

    o_ref[0] = x1 + y                                        # second residual


def residual_attention_block(q, k, v, key_padding_mask, params, n_head):
    B, Sq, D = q.shape
    Skv = k.shape[1]
    H = n_head
    Dh = D // H
    scale = 1.0 / math.sqrt(Dh)
    f32, bf16 = jnp.float32, jnp.bfloat16

    if key_padding_mask is None:
        key_padding_mask = jnp.zeros((B, Skv), dtype=bool)
    mask_add = jnp.where(key_padding_mask, jnp.float32(-1e9),
                         jnp.float32(0.0)).reshape(B, 1, Skv)

    def r1(x):
        return x.reshape(1, -1).astype(f32)

    wi = params["in_proj_weight"].astype(f32)                # (3D, D), PyTorch (out, in)
    bi = params["in_proj_bias"].astype(f32)                  # (3D,)

    def head_w(w, s=1.0):
        # (D, D) (out, in) -> (H, D_in, Dh_out), bf16, optional scale folded in.
        return (w.reshape(H, Dh, D).transpose(0, 2, 1) * s).astype(bf16)

    def head_b(b, s=1.0):
        return (b.reshape(H, 1, Dh) * s).astype(f32)

    wq_h, wk_h, wv_h = head_w(wi[:D], scale), head_w(wi[D:2 * D]), head_w(wi[2 * D:])
    bq_h, bk_h, bv_h = head_b(bi[:D], scale), head_b(bi[D:2 * D]), head_b(bi[2 * D:])
    wo_h = params["out_proj_weight"].astype(f32).T.reshape(H, Dh, D).astype(bf16)

    args = [
        q.astype(f32), k.astype(f32), v.astype(f32), mask_add,
        r1(params["ln_q"][0]), r1(params["ln_q"][1]),
        r1(params["ln_k"][0]), r1(params["ln_k"][1]),
        r1(params["ln_v"][0]), r1(params["ln_v"][1]),
        r1(params["ln"][0]), r1(params["ln"][1]),
        wq_h, bq_h, wk_h, bk_h, wv_h, bv_h,
        wo_h, r1(params["out_proj_bias"]),
        params["w1"].astype(f32).T.astype(bf16), r1(params["b1"]),
        params["w2"].astype(f32).T.astype(bf16), r1(params["b2"]),
    ]

    def full_spec(a):
        return pl.BlockSpec(a.shape, lambda b, nd=a.ndim: (0,) * nd)

    in_specs = [
        pl.BlockSpec((1, Sq, D), lambda b: (b, 0, 0)),
        pl.BlockSpec((1, Skv, D), lambda b: (b, 0, 0)),
        pl.BlockSpec((1, Skv, D), lambda b: (b, 0, 0)),
        pl.BlockSpec((1, 1, Skv), lambda b: (b, 0, 0)),
    ] + [full_spec(a) for a in args[4:]]

    out_spec = pl.BlockSpec((1, Sq, D), lambda b: (b, 0, 0))

    return pl.pallas_call(
        partial(_rab_kernel, n_head),
        out_shape=jax.ShapeDtypeStruct((B, Sq, D), f32),
        grid_spec=pltpu.PrefetchScalarGridSpec(
            num_scalar_prefetch=0,
            grid=(B,),
            in_specs=in_specs,
            out_specs=out_spec,
        ),
        compiler_params=pltpu.CompilerParams(
            dimension_semantics=("parallel",),
            # Generous ceiling; actual usage at these shapes is a few hundred KiB,
            # and 48 MiB leaves headroom even on v7x (64 MiB physical per TC).
            vmem_limit_bytes=48 * 1024 * 1024,
        ),
    )(*args)


def init_params(key, D):
    ks = iter(jax.random.split(key, 24))

    def nrm(shape, scale):
        return scale * jax.random.normal(next(ks), shape, jnp.float32)

    p = {}
    for name in ("ln_q", "ln_k", "ln_v", "ln"):
        p[name] = (1.0 + nrm((D,), 0.1), nrm((D,), 0.05))
    p["in_proj_weight"] = nrm((3 * D, D), 0.05)
    p["in_proj_bias"] = nrm((3 * D,), 0.02)
    p["out_proj_weight"] = nrm((D, D), 0.05)
    p["out_proj_bias"] = nrm((D,), 0.02)
    p["w1"] = nrm((4 * D, D), 0.05)
    p["b1"] = nrm((4 * D,), 0.02)
    p["w2"] = nrm((D, 4 * D), 0.05)
    p["b2"] = nrm((D,), 0.02)
    return p


def reference(q, k, v, kpm, p, n_head):
    """Pure-JAX (f32) mirror of the PyTorch forward for a correctness check."""
    def ln(x, g, b):
        mu = jnp.mean(x, axis=-1, keepdims=True)
        var = jnp.mean((x - mu) ** 2, axis=-1, keepdims=True)
        return (x - mu) / jnp.sqrt(var + 1e-5) * g + b

    B, Sq, D = q.shape
    Dh = D // n_head
    x0 = q
    qn, kn, vn = ln(q, *p["ln_q"]), ln(k, *p["ln_k"]), ln(v, *p["ln_v"])
    wi, bi = p["in_proj_weight"], p["in_proj_bias"]
    qp = qn @ wi[:D].T + bi[:D]
    kp = kn @ wi[D:2 * D].T + bi[D:2 * D]
    vp = vn @ wi[2 * D:].T + bi[2 * D:]

    def split(x):
        return x.reshape(x.shape[0], x.shape[1], n_head, Dh).transpose(0, 2, 1, 3)

    qh, kh, vh = split(qp) / math.sqrt(Dh), split(kp), split(vp)
    s = jnp.einsum("bhqd,bhkd->bhqk", qh, kh)
    s = s + jnp.where(kpm, -1e9, 0.0)[:, None, None, :]
    a = jax.nn.softmax(s, axis=-1)
    o = jnp.einsum("bhqk,bhkd->bhqd", a, vh).transpose(0, 2, 1, 3).reshape(B, Sq, D)
    o = o @ p["out_proj_weight"].T + p["out_proj_bias"]
    x1 = x0 + o
    xn = ln(x1, *p["ln"])
    h = xn @ p["w1"].T + p["b1"]
    h = 0.5 * h * (1.0 + jax.scipy.special.erf(h / jnp.sqrt(2.0)))
    y = h @ p["w2"].T + p["b2"]
    return x1 + y


if __name__ == "__main__":
    B, S, D, H = 2, 8, 32, 4
    key = jax.random.PRNGKey(0)
    k_q, k_k, k_v, k_p = jax.random.split(key, 4)

    q = jax.random.normal(k_q, (B, S, D), jnp.float32)
    k = jax.random.normal(k_k, (B, S, D), jnp.float32)
    v = jax.random.normal(k_v, (B, S, D), jnp.float32)
    # key_padding_mask: True = ignore that key (PyTorch convention); pad last 2 keys of batch 1.
    key_padding_mask = jnp.zeros((B, S), dtype=bool).at[1, -2:].set(True)

    params = init_params(k_p, D)

    out = residual_attention_block(q, k, v, key_padding_mask, params, n_head=H)
    out = jax.block_until_ready(out)

    ref = reference(q, k, v, key_padding_mask, params, H)
    err = float(jnp.max(jnp.abs(out - ref)))
    # Tolerance accounts for bf16 matmul operands (f32 accumulation) and the
    # approximate EUP reciprocal in the softmax normalization.
    assert err < 2e-2, f"max abs error {err}"
    print("KERNEL_OK")
</pallas_src>

<mosaic_0001>
module attributes {stable_mosaic.version = 11 : i64} {
  func.func @_rab_kernel(%arg0: i32, %arg1: memref<1x8x32xf32, #tpu.memory_space<vmem>>, %arg2: memref<1x8x32xf32, #tpu.memory_space<vmem>>, %arg3: memref<1x8x32xf32, #tpu.memory_space<vmem>>, %arg4: memref<1x1x8xf32, #tpu.memory_space<vmem>>, %arg5: memref<1x32xf32, #tpu.memory_space<vmem>>, %arg6: memref<1x32xf32, #tpu.memory_space<vmem>>, %arg7: memref<1x32xf32, #tpu.memory_space<vmem>>, %arg8: memref<1x32xf32, #tpu.memory_space<vmem>>, %arg9: memref<1x32xf32, #tpu.memory_space<vmem>>, %arg10: memref<1x32xf32, #tpu.memory_space<vmem>>, %arg11: memref<1x32xf32, #tpu.memory_space<vmem>>, %arg12: memref<1x32xf32, #tpu.memory_space<vmem>>, %arg13: memref<4x32x8xbf16, #tpu.memory_space<vmem>>, %arg14: memref<4x1x8xf32, #tpu.memory_space<vmem>>, %arg15: memref<4x32x8xbf16, #tpu.memory_space<vmem>>, %arg16: memref<4x1x8xf32, #tpu.memory_space<vmem>>, %arg17: memref<4x32x8xbf16, #tpu.memory_space<vmem>>, %arg18: memref<4x1x8xf32, #tpu.memory_space<vmem>>, %arg19: memref<4x8x32xbf16, #tpu.memory_space<vmem>>, %arg20: memref<1x32xf32, #tpu.memory_space<vmem>>, %arg21: memref<32x128xbf16, #tpu.memory_space<vmem>>, %arg22: memref<1x128xf32, #tpu.memory_space<vmem>>, %arg23: memref<128x32xbf16, #tpu.memory_space<vmem>>, %arg24: memref<1x32xf32, #tpu.memory_space<vmem>>, %arg25: memref<1x8x32xf32, #tpu.memory_space<vmem>>) attributes {dimension_semantics = [#tpu.dimension_semantics<parallel>], iteration_bounds = array<i64: 2>, scalar_prefetch = 0 : i64, scratch_operands = 0 : i64, tpu.core_type = #tpu.core_type<tc>, window_params = [{transform_indices = @transform_0, window_bounds = array<i64: 1, 8, 32>}, {transform_indices = @transform_1, window_bounds = array<i64: 1, 8, 32>}, {transform_indices = @transform_2, window_bounds = array<i64: 1, 8, 32>}, {transform_indices = @transform_3, window_bounds = array<i64: 1, 1, 8>}, {pipeline_mode = #tpu.pipeline_mode<synchronous>, transform_indices = @transform_4, window_bounds = array<i64: 1, 32>}, {pipeline_mode = #tpu.pipeline_mode<synchronous>, transform_indices = @transform_5, window_bounds = array<i64: 1, 32>}, {pipeline_mode = #tpu.pipeline_mode<synchronous>, transform_indices = @transform_6, window_bounds = array<i64: 1, 32>}, {pipeline_mode = #tpu.pipeline_mode<synchronous>, transform_indices = @transform_7, window_bounds = array<i64: 1, 32>}, {pipeline_mode = #tpu.pipeline_mode<synchronous>, transform_indices = @transform_8, window_bounds = array<i64: 1, 32>}, {pipeline_mode = #tpu.pipeline_mode<synchronous>, transform_indices = @transform_9, window_bounds = array<i64: 1, 32>}, {pipeline_mode = #tpu.pipeline_mode<synchronous>, transform_indices = @transform_10, window_bounds = array<i64: 1, 32>}, {pipeline_mode = #tpu.pipeline_mode<synchronous>, transform_indices = @transform_11, window_bounds = array<i64: 1, 32>}, {pipeline_mode = #tpu.pipeline_mode<synchronous>, transform_indices = @transform_12, window_bounds = array<i64: 4, 32, 8>}, {pipeline_mode = #tpu.pipeline_mode<synchronous>, transform_indices = @transform_13, window_bounds = array<i64: 4, 1, 8>}, {pipeline_mode = #tpu.pipeline_mode<synchronous>, transform_indices = @transform_14, window_bounds = array<i64: 4, 32, 8>}, {pipeline_mode = #tpu.pipeline_mode<synchronous>, transform_indices = @transform_15, window_bounds = array<i64: 4, 1, 8>}, {pipeline_mode = #tpu.pipeline_mode<synchronous>, transform_indices = @transform_16, window_bounds = array<i64: 4, 32, 8>}, {pipeline_mode = #tpu.pipeline_mode<synchronous>, transform_indices = @transform_17, window_bounds = array<i64: 4, 1, 8>}, {pipeline_mode = #tpu.pipeline_mode<synchronous>, transform_indices = @transform_18, window_bounds = array<i64: 4, 8, 32>}, {pipeline_mode = #tpu.pipeline_mode<synchronous>, transform_indices = @transform_19, window_bounds = array<i64: 1, 32>}, {pipeline_mode = #tpu.pipeline_mode<synchronous>, transform_indices = @transform_20, window_bounds = array<i64: 32, 128>}, {pipeline_mode = #tpu.pipeline_mode<synchronous>, transform_indices = @transform_21, window_bounds = array<i64: 1, 128>}, {pipeline_mode = #tpu.pipeline_mode<synchronous>, transform_indices = @transform_22, window_bounds = array<i64: 128, 32>}, {pipeline_mode = #tpu.pipeline_mode<synchronous>, transform_indices = @transform_23, window_bounds = array<i64: 1, 32>}, {transform_indices = @transform_24, window_bounds = array<i64: 1, 8, 32>}]} {
    %c0 = arith.constant 0 : index
    %c0_0 = arith.constant 0 : index
    %c0_1 = arith.constant 0 : index
    %0 = vector.load %arg1[%c0, %c0_0, %c0_1] : memref<1x8x32xf32, #tpu.memory_space<vmem>>, vector<1x8x32xf32>
    %1 = vector.shape_cast %0 : vector<1x8x32xf32> to vector<8x32xf32>
    %c0_2 = arith.constant 0 : index
    %c0_3 = arith.constant 0 : index
    %2 = vector.load %arg5[%c0_2, %c0_3] : memref<1x32xf32, #tpu.memory_space<vmem>>, vector<1x32xf32>
    %c0_4 = arith.constant 0 : index
    %c0_5 = arith.constant 0 : index
    %3 = vector.load %arg6[%c0_4, %c0_5] : memref<1x32xf32, #tpu.memory_space<vmem>>, vector<1x32xf32>
    %cst = arith.constant dense<0.000000e+00> : vector<8xf32>
    %4 = vector.multi_reduction <add>, %1, %cst [1] : vector<8x32xf32> to vector<8xf32>
    %5 = vector.shape_cast %4 : vector<8xf32> to vector<8x1xf32>
    %cst_6 = arith.constant 3.200000e+01 : f32
    %6 = vector.broadcast %cst_6 : f32 to vector<8x1xf32>
    %7 = arith.divf %5, %6 : vector<8x1xf32>
    %8 = vector.broadcast %7 : vector<8x1xf32> to vector<8x32xf32>
    %9 = arith.subf %1, %8 : vector<8x32xf32>
    %10 = arith.mulf %9, %9 : vector<8x32xf32>
    %cst_7 = arith.constant dense<0.000000e+00> : vector<8xf32>
    %11 = vector.multi_reduction <add>, %10, %cst_7 [1] : vector<8x32xf32> to vector<8xf32>
    %12 = vector.shape_cast %11 : vector<8xf32> to vector<8x1xf32>
    %cst_8 = arith.constant 3.200000e+01 : f32
    %13 = vector.broadcast %cst_8 : f32 to vector<8x1xf32>
    %14 = arith.divf %12, %13 : vector<8x1xf32>
    %15 = vector.broadcast %7 : vector<8x1xf32> to vector<8x32xf32>
    %16 = arith.subf %1, %15 : vector<8x32xf32>
    %cst_9 = arith.constant 9.99999974E-6 : f32
    %17 = vector.broadcast %cst_9 : f32 to vector<8x1xf32>
    %18 = arith.addf %14, %17 : vector<8x1xf32>
    %19 = math.rsqrt %18 : vector<8x1xf32>
    %20 = vector.broadcast %19 : vector<8x1xf32> to vector<8x32xf32>
    %21 = arith.mulf %16, %20 : vector<8x32xf32>
    %22 = vector.broadcast %2 : vector<1x32xf32> to vector<8x32xf32>
    %23 = arith.mulf %21, %22 : vector<8x32xf32>
    %24 = vector.broadcast %3 : vector<1x32xf32> to vector<8x32xf32>
    %25 = arith.addf %23, %24 : vector<8x32xf32>
    %26 = arith.truncf %25 : vector<8x32xf32> to vector<8x32xbf16>
    %c0_10 = arith.constant 0 : index
    %c0_11 = arith.constant 0 : index
    %c0_12 = arith.constant 0 : index
    %27 = vector.load %arg2[%c0_10, %c0_11, %c0_12] : memref<1x8x32xf32, #tpu.memory_space<vmem>>, vector<1x8x32xf32>
    %28 = vector.shape_cast %27 : vector<1x8x32xf32> to vector<8x32xf32>
    %c0_13 = arith.constant 0 : index
    %c0_14 = arith.constant 0 : index
    %29 = vector.load %arg7[%c0_13, %c0_14] : memref<1x32xf32, #tpu.memory_space<vmem>>, vector<1x32xf32>
    %c0_15 = arith.constant 0 : index
    %c0_16 = arith.constant 0 : index
    %30 = vector.load %arg8[%c0_15, %c0_16] : memref<1x32xf32, #tpu.memory_space<vmem>>, vector<1x32xf32>
    %cst_17 = arith.constant dense<0.000000e+00> : vector<8xf32>
    %31 = vector.multi_reduction <add>, %28, %cst_17 [1] : vector<8x32xf32> to vector<8xf32>
    %32 = vector.shape_cast %31 : vector<8xf32> to vector<8x1xf32>
    %cst_18 = arith.constant 3.200000e+01 : f32
    %33 = vector.broadcast %cst_18 : f32 to vector<8x1xf32>
    %34 = arith.divf %32, %33 : vector<8x1xf32>
    %35 = vector.broadcast %34 : vector<8x1xf32> to vector<8x32xf32>
    %36 = arith.subf %28, %35 : vector<8x32xf32>
    %37 = arith.mulf %36, %36 : vector<8x32xf32>
    %cst_19 = arith.constant dense<0.000000e+00> : vector<8xf32>
    %38 = vector.multi_reduction <add>, %37, %cst_19 [1] : vector<8x32xf32> to vector<8xf32>
    %39 = vector.shape_cast %38 : vector<8xf32> to vector<8x1xf32>
    %cst_20 = arith.constant 3.200000e+01 : f32
    %40 = vector.broadcast %cst_20 : f32 to vector<8x1xf32>
    %41 = arith.divf %39, %40 : vector<8x1xf32>
    %42 = vector.broadcast %34 : vector<8x1xf32> to vector<8x32xf32>
    %43 = arith.subf %28, %42 : vector<8x32xf32>
    %cst_21 = arith.constant 9.99999974E-6 : f32
    %44 = vector.broadcast %cst_21 : f32 to vector<8x1xf32>
    %45 = arith.addf %41, %44 : vector<8x1xf32>
    %46 = math.rsqrt %45 : vector<8x1xf32>
    %47 = vector.broadcast %46 : vector<8x1xf32> to vector<8x32xf32>
    %48 = arith.mulf %43, %47 : vector<8x32xf32>
    %49 = vector.broadcast %29 : vector<1x32xf32> to vector<8x32xf32>
    %50 = arith.mulf %48, %49 : vector<8x32xf32>
    %51 = vector.broadcast %30 : vector<1x32xf32> to vector<8x32xf32>
    %52 = arith.addf %50, %51 : vector<8x32xf32>
    %53 = arith.truncf %52 : vector<8x32xf32> to vector<8x32xbf16>
    %c0_22 = arith.constant 0 : index
    %c0_23 = arith.constant 0 : index
    %c0_24 = arith.constant 0 : index
    %54 = vector.load %arg3[%c0_22, %c0_23, %c0_24] : memref<1x8x32xf32, #tpu.memory_space<vmem>>, vector<1x8x32xf32>
    %55 = vector.shape_cast %54 : vector<1x8x32xf32> to vector<8x32xf32>
    %c0_25 = arith.constant 0 : index
    %c0_26 = arith.constant 0 : index
    %56 = vector.load %arg9[%c0_25, %c0_26] : memref<1x32xf32, #tpu.memory_space<vmem>>, vector<1x32xf32>
    %c0_27 = arith.constant 0 : index
    %c0_28 = arith.constant 0 : index
    %57 = vector.load %arg10[%c0_27, %c0_28] : memref<1x32xf32, #tpu.memory_space<vmem>>, vector<1x32xf32>
    %cst_29 = arith.constant dense<0.000000e+00> : vector<8xf32>
    %58 = vector.multi_reduction <add>, %55, %cst_29 [1] : vector<8x32xf32> to vector<8xf32>
    %59 = vector.shape_cast %58 : vector<8xf32> to vector<8x1xf32>
    %cst_30 = arith.constant 3.200000e+01 : f32
    %60 = vector.broadcast %cst_30 : f32 to vector<8x1xf32>
    %61 = arith.divf %59, %60 : vector<8x1xf32>
    %62 = vector.broadcast %61 : vector<8x1xf32> to vector<8x32xf32>
    %63 = arith.subf %55, %62 : vector<8x32xf32>
    %64 = arith.mulf %63, %63 : vector<8x32xf32>
    %cst_31 = arith.constant dense<0.000000e+00> : vector<8xf32>
    %65 = vector.multi_reduction <add>, %64, %cst_31 [1] : vector<8x32xf32> to vector<8xf32>
    %66 = vector.shape_cast %65 : vector<8xf32> to vector<8x1xf32>
    %cst_32 = arith.constant 3.200000e+01 : f32
    %67 = vector.broadcast %cst_32 : f32 to vector<8x1xf32>
    %68 = arith.divf %66, %67 : vector<8x1xf32>
    %69 = vector.broadcast %61 : vector<8x1xf32> to vector<8x32xf32>
    %70 = arith.subf %55, %69 : vector<8x32xf32>
    %cst_33 = arith.constant 9.99999974E-6 : f32
    %71 = vector.broadcast %cst_33 : f32 to vector<8x1xf32>
    %72 = arith.addf %68, %71 : vector<8x1xf32>
    %73 = math.rsqrt %72 : vector<8x1xf32>
    %74 = vector.broadcast %73 : vector<8x1xf32> to vector<8x32xf32>
    %75 = arith.mulf %70, %74 : vector<8x32xf32>
    %76 = vector.broadcast %56 : vector<1x32xf32> to vector<8x32xf32>
    %77 = arith.mulf %75, %76 : vector<8x32xf32>
    %78 = vector.broadcast %57 : vector<1x32xf32> to vector<8x32xf32>
    %79 = arith.addf %77, %78 : vector<8x32xf32>
    %80 = arith.truncf %79 : vector<8x32xf32> to vector<8x32xbf16>
    %81 = vector.shape_cast %26 : vector<8x32xbf16> to vector<1x8x32xbf16>
    %82 = vector.shape_cast %81 : vector<1x8x32xbf16> to vector<1x8x32xbf16>
    %83 = vector.broadcast %82 : vector<1x8x32xbf16> to vector<4x8x32xbf16>
    %c0_34 = arith.constant 0 : index
    %c0_35 = arith.constant 0 : index
    %c0_36 = arith.constant 0 : index
    %84 = vector.load %arg13[%c0_34, %c0_35, %c0_36] : memref<4x32x8xbf16, #tpu.memory_space<vmem>>, vector<4x32x8xbf16>
    %cst_37 = arith.constant dense<0.000000e+00> : vector<4x8x8xf32>
    %85 = tpu.matmul %83, %84, %cst_37 {dimension_numbers = #tpu.dot_dimension_numbers<[2], [1], [1], [2], [0, 0, 0, 1, 1, 2], [0], [0]>} : vector<4x8x32xbf16>, vector<4x32x8xbf16>, vector<4x8x8xf32> -> vector<4x8x8xf32>
    %c0_38 = arith.constant 0 : index
    %c0_39 = arith.constant 0 : index
    %c0_40 = arith.constant 0 : index
    %86 = vector.load %arg14[%c0_38, %c0_39, %c0_40] : memref<4x1x8xf32, #tpu.memory_space<vmem>>, vector<4x1x8xf32>
    %87 = vector.broadcast %86 : vector<4x1x8xf32> to vector<4x8x8xf32>
    %88 = arith.addf %85, %87 : vector<4x8x8xf32>
    %89 = vector.shape_cast %53 : vector<8x32xbf16> to vector<1x8x32xbf16>
    %90 = vector.shape_cast %89 : vector<1x8x32xbf16> to vector<1x8x32xbf16>
    %91 = vector.broadcast %90 : vector<1x8x32xbf16> to vector<4x8x32xbf16>
    %c0_41 = arith.constant 0 : index
    %c0_42 = arith.constant 0 : index
    %c0_43 = arith.constant 0 : index
    %92 = vector.load %arg15[%c0_41, %c0_42, %c0_43] : memref<4x32x8xbf16, #tpu.memory_space<vmem>>, vector<4x32x8xbf16>
    %cst_44 = arith.constant dense<0.000000e+00> : vector<4x8x8xf32>
    %93 = tpu.matmul %91, %92, %cst_44 {dimension_numbers = #tpu.dot_dimension_numbers<[2], [1], [1], [2], [0, 0, 0, 1, 1, 2], [0], [0]>} : vector<4x8x32xbf16>, vector<4x32x8xbf16>, vector<4x8x8xf32> -> vector<4x8x8xf32>
    %c0_45 = arith.constant 0 : index
    %c0_46 = arith.constant 0 : index
    %c0_47 = arith.constant 0 : index
    %94 = vector.load %arg16[%c0_45, %c0_46, %c0_47] : memref<4x1x8xf32, #tpu.memory_space<vmem>>, vector<4x1x8xf32>
    %95 = vector.broadcast %94 : vector<4x1x8xf32> to vector<4x8x8xf32>
    %96 = arith.addf %93, %95 : vector<4x8x8xf32>
    %97 = vector.shape_cast %80 : vector<8x32xbf16> to vector<1x8x32xbf16>
    %98 = vector.shape_cast %97 : vector<1x8x32xbf16> to vector<1x8x32xbf16>
    %99 = vector.broadcast %98 : vector<1x8x32xbf16> to vector<4x8x32xbf16>
    %c0_48 = arith.constant 0 : index
    %c0_49 = arith.constant 0 : index
    %c0_50 = arith.constant 0 : index
    %100 = vector.load %arg17[%c0_48, %c0_49, %c0_50] : memref<4x32x8xbf16, #tpu.memory_space<vmem>>, vector<4x32x8xbf16>
    %cst_51 = arith.constant dense<0.000000e+00> : vector<4x8x8xf32>
    %101 = tpu.matmul %99, %100, %cst_51 {dimension_numbers = #tpu.dot_dimension_numbers<[2], [1], [1], [2], [0, 0, 0, 1, 1, 2], [0], [0]>} : vector<4x8x32xbf16>, vector<4x32x8xbf16>, vector<4x8x8xf32> -> vector<4x8x8xf32>
    %c0_52 = arith.constant 0 : index
    %c0_53 = arith.constant 0 : index
    %c0_54 = arith.constant 0 : index
    %102 = vector.load %arg18[%c0_52, %c0_53, %c0_54] : memref<4x1x8xf32, #tpu.memory_space<vmem>>, vector<4x1x8xf32>
    %103 = vector.broadcast %102 : vector<4x1x8xf32> to vector<4x8x8xf32>
    %104 = arith.addf %101, %103 : vector<4x8x8xf32>
    %105 = arith.truncf %104 : vector<4x8x8xf32> to vector<4x8x8xbf16>
    %106 = arith.truncf %88 : vector<4x8x8xf32> to vector<4x8x8xbf16>
    %107 = arith.truncf %96 : vector<4x8x8xf32> to vector<4x8x8xbf16>
    "tpu.trace_start"() <{level = 10 : i32, message = "hqd,hkd->hqk"}> : () -> ()
    %cst_55 = arith.constant dense<0.000000e+00> : vector<4x8x8xf32>
    %108 = tpu.matmul %106, %107, %cst_55 {dimension_numbers = #tpu.dot_dimension_numbers<[2], [2], [1], [1], [0, 0, 0, 1, 1, 1], [0], [0]>} : vector<4x8x8xbf16>, vector<4x8x8xbf16>, vector<4x8x8xf32> -> vector<4x8x8xf32>
    "tpu.trace_stop"() : () -> ()
    %c0_56 = arith.constant 0 : index
    %c0_57 = arith.constant 0 : index
    %c0_58 = arith.constant 0 : index
    %109 = vector.load %arg4[%c0_56, %c0_57, %c0_58] : memref<1x1x8xf32, #tpu.memory_space<vmem>>, vector<1x1x8xf32>
    %110 = vector.broadcast %109 : vector<1x1x8xf32> to vector<4x8x8xf32>
    %111 = arith.addf %108, %110 : vector<4x8x8xf32>
    %cst_59 = arith.constant dense<0xFF800000> : vector<4x8xf32>
    %112 = vector.multi_reduction <maximumf>, %111, %cst_59 [2] : vector<4x8x8xf32> to vector<4x8xf32>
    %113 = vector.shape_cast %112 : vector<4x8xf32> to vector<4x8x1xf32>
    %114 = vector.broadcast %113 : vector<4x8x1xf32> to vector<4x8x8xf32>
    %115 = arith.subf %111, %114 : vector<4x8x8xf32>
    %116 = math.exp %115 : vector<4x8x8xf32>
    %cst_60 = arith.constant dense<0.000000e+00> : vector<4x8xf32>
    %117 = vector.multi_reduction <add>, %116, %cst_60 [2] : vector<4x8x8xf32> to vector<4x8xf32>
    %118 = vector.shape_cast %117 : vector<4x8xf32> to vector<4x8x1xf32>
    %119 = tpu.reciprocal %118 {approx = true} : vector<4x8x1xf32> -> vector<4x8x1xf32>
    %120 = arith.truncf %116 : vector<4x8x8xf32> to vector<4x8x8xbf16>
    "tpu.trace_start"() <{level = 10 : i32, message = "hqk,hkd->hqd"}> : () -> ()
    %cst_61 = arith.constant dense<0.000000e+00> : vector<4x8x8xf32>
    %121 = tpu.matmul %120, %105, %cst_61 {dimension_numbers = #tpu.dot_dimension_numbers<[2], [1], [1], [2], [0, 0, 0, 1, 1, 2], [0], [0]>} : vector<4x8x8xbf16>, vector<4x8x8xbf16>, vector<4x8x8xf32> -> vector<4x8x8xf32>
    "tpu.trace_stop"() : () -> ()
    %122 = vector.broadcast %119 : vector<4x8x1xf32> to vector<4x8x8xf32>
    %123 = arith.mulf %121, %122 : vector<4x8x8xf32>
    %124 = arith.truncf %123 : vector<4x8x8xf32> to vector<4x8x8xbf16>
    %c0_62 = arith.constant 0 : index
    %c0_63 = arith.constant 0 : index
    %c0_64 = arith.constant 0 : index
    %125 = vector.load %arg19[%c0_62, %c0_63, %c0_64] : memref<4x8x32xbf16, #tpu.memory_space<vmem>>, vector<4x8x32xbf16>
    %cst_65 = arith.constant dense<0.000000e+00> : vector<4x8x32xf32>
    %126 = tpu.matmul %124, %125, %cst_65 {dimension_numbers = #tpu.dot_dimension_numbers<[2], [1], [1], [2], [0, 0, 0, 1, 1, 2], [0], [0]>} : vector<4x8x8xbf16>, vector<4x8x32xbf16>, vector<4x8x32xf32> -> vector<4x8x32xf32>
    %cst_66 = arith.constant dense<0.000000e+00> : vector<8x32xf32>
    %127 = vector.multi_reduction <add>, %126, %cst_66 [0] : vector<4x8x32xf32> to vector<8x32xf32>
    %c0_67 = arith.constant 0 : index
    %c0_68 = arith.constant 0 : index
    %128 = vector.load %arg20[%c0_67, %c0_68] : memref<1x32xf32, #tpu.memory_space<vmem>>, vector<1x32xf32>
    %129 = vector.broadcast %128 : vector<1x32xf32> to vector<8x32xf32>
    %130 = arith.addf %127, %129 : vector<8x32xf32>
    %131 = arith.addf %1, %130 : vector<8x32xf32>
    %c0_69 = arith.constant 0 : index
    %c0_70 = arith.constant 0 : index
    %132 = vector.load %arg11[%c0_69, %c0_70] : memref<1x32xf32, #tpu.memory_space<vmem>>, vector<1x32xf32>
    %c0_71 = arith.constant 0 : index
    %c0_72 = arith.constant 0 : index
    %133 = vector.load %arg12[%c0_71, %c0_72] : memref<1x32xf32, #tpu.memory_space<vmem>>, vector<1x32xf32>
    %cst_73 = arith.constant dense<0.000000e+00> : vector<8xf32>
    %134 = vector.multi_reduction <add>, %131, %cst_73 [1] : vector<8x32xf32> to vector<8xf32>
    %135 = vector.shape_cast %134 : vector<8xf32> to vector<8x1xf32>
    %cst_74 = arith.constant 3.200000e+01 : f32
    %136 = vector.broadcast %cst_74 : f32 to vector<8x1xf32>
    %137 = arith.divf %135, %136 : vector<8x1xf32>
    %138 = vector.broadcast %137 : vector<8x1xf32> to vector<8x32xf32>
    %139 = arith.subf %131, %138 : vector<8x32xf32>
    %140 = arith.mulf %139, %139 : vector<8x32xf32>
    %cst_75 = arith.constant dense<0.000000e+00> : vector<8xf32>
    %141 = vector.multi_reduction <add>, %140, %cst_75 [1] : vector<8x32xf32> to vector<8xf32>
    %142 = vector.shape_cast %141 : vector<8xf32> to vector<8x1xf32>
    %cst_76 = arith.constant 3.200000e+01 : f32
    %143 = vector.broadcast %cst_76 : f32 to vector<8x1xf32>
    %144 = arith.divf %142, %143 : vector<8x1xf32>
    %145 = vector.broadcast %137 : vector<8x1xf32> to vector<8x32xf32>
    %146 = arith.subf %131, %145 : vector<8x32xf32>
    %cst_77 = arith.constant 9.99999974E-6 : f32
    %147 = vector.broadcast %cst_77 : f32 to vector<8x1xf32>
    %148 = arith.addf %144, %147 : vector<8x1xf32>
    %149 = math.rsqrt %148 : vector<8x1xf32>
    %150 = vector.broadcast %149 : vector<8x1xf32> to vector<8x32xf32>
    %151 = arith.mulf %146, %150 : vector<8x32xf32>
    %152 = vector.broadcast %132 : vector<1x32xf32> to vector<8x32xf32>
    %153 = arith.mulf %151, %152 : vector<8x32xf32>
    %154 = vector.broadcast %133 : vector<1x32xf32> to vector<8x32xf32>
    %155 = arith.addf %153, %154 : vector<8x32xf32>
    %156 = arith.truncf %155 : vector<8x32xf32> to vector<8x32xbf16>
    %c0_78 = arith.constant 0 : index
    %c0_79 = arith.constant 0 : index
    %157 = vector.load %arg21[%c0_78, %c0_79] : memref<32x128xbf16, #tpu.memory_space<vmem>>, vector<32x128xbf16>
    %cst_80 = arith.constant dense<0.000000e+00> : vector<8x128xf32>
    %158 = tpu.matmul %156, %157, %cst_80 {dimension_numbers = #tpu.dot_dimension_numbers<[1], [0], [0], [1], [0, 0, 1, 1], [], []>} : vector<8x32xbf16>, vector<32x128xbf16>, vector<8x128xf32> -> vector<8x128xf32>
    %c0_81 = arith.constant 0 : index
    %c0_82 = arith.constant 0 : index
    %159 = vector.load %arg22[%c0_81, %c0_82] : memref<1x128xf32, #tpu.memory_space<vmem>>, vector<1x128xf32>
    %160 = vector.broadcast %159 : vector<1x128xf32> to vector<8x128xf32>
    %161 = arith.addf %158, %160 : vector<8x128xf32>
    %cst_83 = arith.constant 5.000000e-01 : f32
    %162 = vector.broadcast %cst_83 : f32 to vector<8x128xf32>
    %163 = arith.mulf %162, %161 : vector<8x128xf32>
    %cst_84 = arith.constant 0.707106769 : f32
    %164 = vector.broadcast %cst_84 : f32 to vector<8x128xf32>
    %165 = arith.mulf %161, %164 : vector<8x128xf32>
    %cst_85 = arith.constant 0.000000e+00 : f32
    %166 = vector.broadcast %cst_85 : f32 to vector<8x128xf32>
    %167 = arith.cmpf oge, %165, %166 : vector<8x128xf32>
    %cst_86 = arith.constant 1.000000e+00 : f32
    %cst_87 = arith.constant -1.000000e+00 : f32
    %168 = vector.broadcast %cst_86 : f32 to vector<8x128xf32>
    %169 = vector.broadcast %cst_87 : f32 to vector<8x128xf32>
    %170 = arith.select %167, %168, %169 : vector<8x128xi1>, vector<8x128xf32>
    %171 = math.absf %165 : vector<8x128xf32>
    %cst_88 = arith.constant 0.327591091 : f32
    %172 = vector.broadcast %cst_88 : f32 to vector<8x128xf32>
    %173 = arith.mulf %172, %171 : vector<8x128xf32>
    %cst_89 = arith.constant 1.000000e+00 : f32
    %174 = vector.broadcast %cst_89 : f32 to vector<8x128xf32>
    %175 = arith.addf %174, %173 : vector<8x128xf32>
    %cst_90 = arith.constant 1.000000e+00 : f32
    %176 = vector.broadcast %cst_90 : f32 to vector<8x128xf32>
    %177 = arith.divf %176, %175 : vector<8x128xf32>
    %cst_91 = arith.constant 1.06140542 : f32
    %178 = vector.broadcast %cst_91 : f32 to vector<8x128xf32>
    %179 = arith.mulf %178, %177 : vector<8x128xf32>
    %cst_92 = arith.constant -1.45315206 : f32
    %180 = vector.broadcast %cst_92 : f32 to vector<8x128xf32>
    %181 = arith.addf %179, %180 : vector<8x128xf32>
    %182 = arith.mulf %181, %177 : vector<8x128xf32>
    %cst_93 = arith.constant 1.42141378 : f32
    %183 = vector.broadcast %cst_93 : f32 to vector<8x128xf32>
    %184 = arith.addf %182, %183 : vector<8x128xf32>
    %185 = arith.mulf %184, %177 : vector<8x128xf32>
    %cst_94 = arith.constant -0.284496725 : f32
    %186 = vector.broadcast %cst_94 : f32 to vector<8x128xf32>
    %187 = arith.addf %185, %186 : vector<8x128xf32>
    %188 = arith.mulf %187, %177 : vector<8x128xf32>
    %cst_95 = arith.constant 0.254829586 : f32
    %189 = vector.broadcast %cst_95 : f32 to vector<8x128xf32>
    %190 = arith.addf %188, %189 : vector<8x128xf32>
    %191 = arith.mulf %190, %177 : vector<8x128xf32>
    %cst_96 = arith.constant 0.000000e+00 : f32
    %192 = vector.broadcast %cst_96 : f32 to vector<8x128xf32>
    %193 = arith.subf %192, %171 : vector<8x128xf32>
    %194 = arith.mulf %193, %171 : vector<8x128xf32>
    %195 = math.exp %194 : vector<8x128xf32>
    %196 = arith.mulf %191, %195 : vector<8x128xf32>
    %cst_97 = arith.constant 1.000000e+00 : f32
    %197 = vector.broadcast %cst_97 : f32 to vector<8x128xf32>
    %198 = arith.subf %197, %196 : vector<8x128xf32>
    %199 = arith.mulf %170, %198 : vector<8x128xf32>
    %cst_98 = arith.constant 1.000000e+00 : f32
    %200 = vector.broadcast %cst_98 : f32 to vector<8x128xf32>
    %201 = arith.addf %200, %199 : vector<8x128xf32>
    %202 = arith.mulf %163, %201 : vector<8x128xf32>
    %203 = arith.truncf %202 : vector<8x128xf32> to vector<8x128xbf16>
    %c0_99 = arith.constant 0 : index
    %c0_100 = arith.constant 0 : index
    %204 = vector.load %arg23[%c0_99, %c0_100] : memref<128x32xbf16, #tpu.memory_space<vmem>>, vector<128x32xbf16>
    %cst_101 = arith.constant dense<0.000000e+00> : vector<8x32xf32>
    %205 = tpu.matmul %203, %204, %cst_101 {dimension_numbers = #tpu.dot_dimension_numbers<[1], [0], [0], [1], [0, 0, 1, 1], [], []>} : vector<8x128xbf16>, vector<128x32xbf16>, vector<8x32xf32> -> vector<8x32xf32>
    %c0_102 = arith.constant 0 : index
    %c0_103 = arith.constant 0 : index
    %206 = vector.load %arg24[%c0_102, %c0_103] : memref<1x32xf32, #tpu.memory_space<vmem>>, vector<1x32xf32>
    %207 = vector.broadcast %206 : vector<1x32xf32> to vector<8x32xf32>
    %208 = arith.addf %205, %207 : vector<8x32xf32>
    %209 = arith.addf %131, %208 : vector<8x32xf32>
    %c0_104 = arith.constant 0 : index
    %c0_105 = arith.constant 0 : index
    %c0_106 = arith.constant 0 : index
    %210 = vector.load %arg25[%c0_104, %c0_105, %c0_106] : memref<1x8x32xf32, #tpu.memory_space<vmem>>, vector<1x8x32xf32>
    %211 = vector.shape_cast %210 : vector<1x8x32xf32> to vector<8x32xf32>
    %212 = vector.shape_cast %209 : vector<8x32xf32> to vector<1x8x32xf32>
    tpu.vector_store %arg25[%c0_104, %c0_105, %c0_106], %212 {strides = array<i32>} : memref<1x8x32xf32, #tpu.memory_space<vmem>>, vector<1x8x32xf32>,
    return
  }
  func.func @transform_0(%arg0: i32) -> (i32, i32, i32) {
    %c0_i32 = arith.constant 0 : i32
    %c0_i32_0 = arith.constant 0 : i32
    %c0_i32_1 = arith.constant 0 : i32
    return %arg0, %c0_i32, %c0_i32_0 : i32, i32, i32
  }
  func.func @transform_1(%arg0: i32) -> (i32, i32, i32) {
    %c0_i32 = arith.constant 0 : i32
    %c0_i32_0 = arith.constant 0 : i32
    %c0_i32_1 = arith.constant 0 : i32
    return %arg0, %c0_i32, %c0_i32_0 : i32, i32, i32
  }
  func.func @transform_2(%arg0: i32) -> (i32, i32, i32) {
    %c0_i32 = arith.constant 0 : i32
    %c0_i32_0 = arith.constant 0 : i32
    %c0_i32_1 = arith.constant 0 : i32
    return %arg0, %c0_i32, %c0_i32_0 : i32, i32, i32
  }
  func.func @transform_3(%arg0: i32) -> (i32, i32, i32) {
    %c0_i32 = arith.constant 0 : i32
    %c0_i32_0 = arith.constant 0 : i32
    %c0_i32_1 = arith.constant 0 : i32
    return %arg0, %c0_i32, %c0_i32_0 : i32, i32, i32
  }
  func.func @transform_4(%arg0: i32) -> (i32, i32) {
    %c0_i32 = arith.constant 0 : i32
    %c0_i32_0 = arith.constant 0 : i32
    %c0_i32_1 = arith.constant 0 : i32
    return %c0_i32, %c0_i32_0 : i32, i32
  }
  func.func @transform_5(%arg0: i32) -> (i32, i32) {
    %c0_i32 = arith.constant 0 : i32
    %c0_i32_0 = arith.constant 0 : i32
    %c0_i32_1 = arith.constant 0 : i32
    return %c0_i32, %c0_i32_0 : i32, i32
  }
  func.func @transform_6(%arg0: i32) -> (i32, i32) {
    %c0_i32 = arith.constant 0 : i32
    %c0_i32_0 = arith.constant 0 : i32
    %c0_i32_1 = arith.constant 0 : i32
    return %c0_i32, %c0_i32_0 : i32, i32
  }
  func.func @transform_7(%arg0: i32) -> (i32, i32) {
    %c0_i32 = arith.constant 0 : i32
    %c0_i32_0 = arith.constant 0 : i32
    %c0_i32_1 = arith.constant 0 : i32
    return %c0_i32, %c0_i32_0 : i32, i32
  }
  func.func @transform_8(%arg0: i32) -> (i32, i32) {
    %c0_i32 = arith.constant 0 : i32
    %c0_i32_0 = arith.constant 0 : i32
    %c0_i32_1 = arith.constant 0 : i32
    return %c0_i32, %c0_i32_0 : i32, i32
  }
  func.func @transform_9(%arg0: i32) -> (i32, i32) {
    %c0_i32 = arith.constant 0 : i32
    %c0_i32_0 = arith.constant 0 : i32
    %c0_i32_1 = arith.constant 0 : i32
    return %c0_i32, %c0_i32_0 : i32, i32
  }
  func.func @transform_10(%arg0: i32) -> (i32, i32) {
    %c0_i32 = arith.constant 0 : i32
    %c0_i32_0 = arith.constant 0 : i32
    %c0_i32_1 = arith.constant 0 : i32
    return %c0_i32, %c0_i32_0 : i32, i32
  }
  func.func @transform_11(%arg0: i32) -> (i32, i32) {
    %c0_i32 = arith.constant 0 : i32
    %c0_i32_0 = arith.constant 0 : i32
    %c0_i32_1 = arith.constant 0 : i32
    return %c0_i32, %c0_i32_0 : i32, i32
  }
  func.func @transform_12(%arg0: i32) -> (i32, i32, i32) {
    %c0_i32 = arith.constant 0 : i32
    %c0_i32_0 = arith.constant 0 : i32
    %c0_i32_1 = arith.constant 0 : i32
    %c0_i32_2 = arith.constant 0 : i32
    return %c0_i32, %c0_i32_0, %c0_i32_1 : i32, i32, i32
  }
  func.func @transform_13(%arg0: i32) -> (i32, i32, i32) {
    %c0_i32 = arith.constant 0 : i32
    %c0_i32_0 = arith.constant 0 : i32
    %c0_i32_1 = arith.constant 0 : i32
    %c0_i32_2 = arith.constant 0 : i32
    return %c0_i32, %c0_i32_0, %c0_i32_1 : i32, i32, i32
  }
  func.func @transform_14(%arg0: i32) -> (i32, i32, i32) {
    %c0_i32 = arith.constant 0 : i32
    %c0_i32_0 = arith.constant 0 : i32
    %c0_i32_1 = arith.constant 0 : i32
    %c0_i32_2 = arith.constant 0 : i32
    return %c0_i32, %c0_i32_0, %c0_i32_1 : i32, i32, i32
  }
  func.func @transform_15(%arg0: i32) -> (i32, i32, i32) {
    %c0_i32 = arith.constant 0 : i32
    %c0_i32_0 = arith.constant 0 : i32
    %c0_i32_1 = arith.constant 0 : i32
    %c0_i32_2 = arith.constant 0 : i32
    return %c0_i32, %c0_i32_0, %c0_i32_1 : i32, i32, i32
  }
  func.func @transform_16(%arg0: i32) -> (i32, i32, i32) {
    %c0_i32 = arith.constant 0 : i32
    %c0_i32_0 = arith.constant 0 : i32
    %c0_i32_1 = arith.constant 0 : i32
    %c0_i32_2 = arith.constant 0 : i32
    return %c0_i32, %c0_i32_0, %c0_i32_1 : i32, i32, i32
  }
  func.func @transform_17(%arg0: i32) -> (i32, i32, i32) {
    %c0_i32 = arith.constant 0 : i32
    %c0_i32_0 = arith.constant 0 : i32
    %c0_i32_1 = arith.constant 0 : i32
    %c0_i32_2 = arith.constant 0 : i32
    return %c0_i32, %c0_i32_0, %c0_i32_1 : i32, i32, i32
  }
  func.func @transform_18(%arg0: i32) -> (i32, i32, i32) {
    %c0_i32 = arith.constant 0 : i32
    %c0_i32_0 = arith.constant 0 : i32
    %c0_i32_1 = arith.constant 0 : i32
    %c0_i32_2 = arith.constant 0 : i32
    return %c0_i32, %c0_i32_0, %c0_i32_1 : i32, i32, i32
  }
  func.func @transform_19(%arg0: i32) -> (i32, i32) {
    %c0_i32 = arith.constant 0 : i32
    %c0_i32_0 = arith.constant 0 : i32
    %c0_i32_1 = arith.constant 0 : i32
    return %c0_i32, %c0_i32_0 : i32, i32
  }
  func.func @transform_20(%arg0: i32) -> (i32, i32) {
    %c0_i32 = arith.constant 0 : i32
    %c0_i32_0 = arith.constant 0 : i32
    %c0_i32_1 = arith.constant 0 : i32
    return %c0_i32, %c0_i32_0 : i32, i32
  }
  func.func @transform_21(%arg0: i32) -> (i32, i32) {
    %c0_i32 = arith.constant 0 : i32
    %c0_i32_0 = arith.constant 0 : i32
    %c0_i32_1 = arith.constant 0 : i32
    return %c0_i32, %c0_i32_0 : i32, i32
  }
  func.func @transform_22(%arg0: i32) -> (i32, i32) {
    %c0_i32 = arith.constant 0 : i32
    %c0_i32_0 = arith.constant 0 : i32
    %c0_i32_1 = arith.constant 0 : i32
    return %c0_i32, %c0_i32_0 : i32, i32
  }
  func.func @transform_23(%arg0: i32) -> (i32, i32) {
    %c0_i32 = arith.constant 0 : i32
    %c0_i32_0 = arith.constant 0 : i32
    %c0_i32_1 = arith.constant 0 : i32
    return %c0_i32, %c0_i32_0 : i32, i32
  }
  func.func @transform_24(%arg0: i32) -> (i32, i32, i32) {
    %c0_i32 = arith.constant 0 : i32
    %c0_i32_0 = arith.constant 0 : i32
    %c0_i32_1 = arith.constant 0 : i32
    return %arg0, %c0_i32, %c0_i32_0 : i32, i32, i32
  }
}

</mosaic_0001>

<bundles_post_ra>
// kernel: tpu_custom_call.1
= control target key start
LH: loop header
LB: loop body
LE: loop exit
PB: predicated region body
PF: predicated region fallthrough
CT: control target
= control target key end

     0   :  { %s3763_s0 = inlined_call_operand.vmem [shape: f32[2,8,32], index: 0, kind: input, shape index: {}]   ;;  %s3764_s1 = inlined_call_operand.vmem [shape: f32[2,8,32], index: 1, kind: input, shape index: {}]   ;;  %s3765_s2 = inlined_call_operand.vmem [shape: f32[2,8,32], index: 2, kind: input, shape index: {}]   ;;  %s3766_s3 = inlined_call_operand.vmem [shape: f32[2,1,8], index: 3, kind: input, shape index: {}]   ;;  %s3767_s4 = inlined_call_operand.vmem [shape: f32[1,32], index: 4, kind: input, shape index: {}]   ;;  %s3768_s5 = inlined_call_operand.vmem [shape: f32[1,32], index: 5, kind: input, shape index: {}]   ;;  %s3769_s6 = inlined_call_operand.vmem [shape: f32[1,32], index: 6, kind: input, shape index: {}]   ;;  %s3770_s7 = inlined_call_operand.vmem [shape: f32[1,32], index: 7, kind: input, shape index: {}]   ;;  %s3771_s8 = inlined_call_operand.vmem [shape: f32[1,32], index: 8, kind: input, shape index: {}]   ;;  %s3772_s9 = inlined_call_operand.vmem [shape: f32[1,32], index: 9, kind: input, shape index: {}]   ;;  %s3773_s10 = inlined_call_operand.vmem [shape: f32[1,32], index: 10, kind: input, shape index: {}]   ;;  %s3774_s11 = inlined_call_operand.vmem [shape: f32[1,32], index: 11, kind: input, shape index: {}]   ;;  %s3775_s12 = inlined_call_operand.vmem [shape: bf16[4,32,8], index: 12, kind: input, shape index: {}]   ;;  %s3776_s13 = inlined_call_operand.vmem [shape: f32[4,1,8], index: 13, kind: input, shape index: {}]   ;;  %s3777_s14 = inlined_call_operand.vmem [shape: bf16[4,32,8], index: 14, kind: input, shape index: {}]   ;;  %s3778_s15 = inlined_call_operand.vmem [shape: f32[4,1,8], index: 15, kind: input, shape index: {}]   ;;  %s3779_s16 = inlined_call_operand.vmem [shape: bf16[4,32,8], index: 16, kind: input, shape index: {}]   ;;  %s3780_s17 = inlined_call_operand.vmem [shape: f32[4,1,8], index: 17, kind: input, shape index: {}]   ;;  %s3781_s18 = inlined_call_operand.vmem [shape: bf16[4,8,32], index: 18, kind: input, shape index: {}]   ;;  %s3782_s19 = inlined_call_operand.vmem [shape: f32[1,32], index: 19, kind: input, shape index: {}]   ;;  %s3783_s20 = inlined_call_operand.vmem [shape: bf16[32,128], index: 20, kind: input, shape index: {}]   ;;  %s3784_s21 = inlined_call_operand.vmem [shape: f32[1,128], index: 21, kind: input, shape index: {}]   ;;  %s3785_s22 = inlined_call_operand.vmem [shape: bf16[128,32], index: 22, kind: input, shape index: {}]   ;;  %s3786_s23 = inlined_call_operand.vmem [shape: f32[1,32], index: 23, kind: input, shape index: {}]   ;;  %s3787_s24 = inlined_call_operand.hbm [shape: f32[2,8,32], index: 24, kind: output, shape index: {}]  }
   0x1   :  { %3797 = sst [smem:[#allocation12_spill]] %s3763_s0 }
   0x2   :  { %3798 = sst [smem:[#allocation13_spill]] %s3764_s1 }
   0x3   :  { %3799 = sst [smem:[#allocation14_spill]] %s3765_s2 }
   0x4   :  { %3800 = sst [smem:[#allocation15_spill]] %s3766_s3 }
   0x5   :  { %3801 = sst [smem:[#allocation16_spill]] %s3767_s4 }
   0x6   :  { %3802 = sst [smem:[#allocation17_spill]] %s3768_s5 }
   0x7   :  { %3803 = sst [smem:[#allocation18_spill]] %s3769_s6 }
   0x8   :  { %3804 = sst [smem:[#allocation19_spill]] %s3770_s7 }
   0x9   :  { %3805 = sst [smem:[#allocation20_spill]] %s3771_s8 }
   0xa   :  { %3806 = sst [smem:[#allocation21_spill]] %s3787_s24 }
   0xb   :  { %29 = vsyncpa [#allocation3], 0 }
   0xc   :  { %31 = vsyncpa [#allocation3 + $0x1], 0  ;;  %s3288_s5 = smov 0   ;;  %s3290_s26 = smov 0  }
   0xd   :  { %s3292_s27 = smov 0   ;;  %s3294_s28 = smov 0  }
   0xe LB: > { %3807 = sst [smem:[#allocation5_spill]] %s3145_s5  ;;  %s3309_s6 = sadd.s32 4294967295, %s3157_s28   ;;  %s3157_s28 = sphi %s3294_s28, %s3830_s28   ;;  %s3153_s27 = sphi %s3292_s27, %s3832_s27   ;;  %s3149_s26 = sphi %s3290_s26, %s3834_s26   ;;  %s3145_s5 = sphi %s3288_s5, %s3833_s5  }
   0xf   : > { %3808 = sst [smem:[#allocation6_spill]] %s3153_s27  ;;  %s2630_s2 = sadd.s32 4294967294, %s3157_s28  }
  0x10   : > { %3809 = sst [smem:[#allocation7_spill]] %s3157_s28  ;;  %s3313_s29 = sadd.s32 1, %s3157_s28  }
  0x11   : > { %3810 = sst [smem:[#allocation8_spill]] %s3313_s29  ;;  %s568_s0 = sadd.s32 1, %s3153_s27 }
  0x12   : > { %s565_s7 = ssub.s32 %s3157_s28, %s3313_s29  ;;  %p578_p0 = scmp.ne.s32.totalorder %s3153_s27, %s3149_s26 }
  0x13   : > { %p566_p1 = scmp.eq.s32.totalorder %s565_s7, 0  ;;  %p579_p2 = scmp.eq.s32.totalorder %s3309_s6, 1 }
  0x14   : > { %p584_p3 = scmp.ne.s32.totalorder %s3149_s26, %s3145_s5  ;;  %p585_p4 = scmp.eq.s32.totalorder %s2630_s2, 1 }
  0x15   : > { %s3324_s30 = scalar_select %p566_p1, %s3153_s27, %s568_s0  }
  0x16   : > { %p3326_p5 = por %p579_p2, %p578_p0  ;;  %p3330_p6 = por %p585_p4, %p584_p3 }
  0x17   : > { %3811 = sst [smem:[#allocation9_spill]] %s3324_s30  ;;  %p2633_p7 = scmp.ge.s32.totalorder %s3157_s28, 1 }
  0x18   : > { %s3812_s3 = scalar_select %p3326_p5, 1, 0 }
  0x19   : > { %s3814_s25 = scalar_select %p3330_p6, 1, 0 }
  0x1a   : > { %3813 = sst [smem:[#allocation10_spill]] %s3812_s3  ;;  %p690_p8 = scmp.lt.s32.totalorder %s3157_s28, 3 }
  0x1b   : > { %3815 = sst [smem:[#allocation11_spill]] %s3814_s25 }
  0x1c   : > { %p691_p9 = pnand %p2633_p7, %p690_p8 }
  0x1d   : > { %p766_p10 = scmp.lt.s32.totalorder (!%p691_p9), %s3309_s6, 1  ;;  %s3816_s0 = sld [smem:[#allocation12_spill]] (!%p691_p9) }
  0x1e   : > { %694 = sbr.rel (%p691_p9) target bundleno = 2108 (0x83c), region = 116  ;;  %s3817_s29 = sld [smem:[#allocation13_spill]] (!%p691_p9) }
  0x1f   : > { %s3818_s24 = sld [smem:[#allocation14_spill]] (!%p691_p9) }
  0x20   : > { %s3819_s2 = sld [smem:[#allocation16_spill]] (!%p691_p9) }
  0x21   : > { %s3821_s28 = sld [smem:[#allocation18_spill]] (!%p691_p9) }
  0x22   : > { %s3824_s1 = sld [smem:[#allocation15_spill]] (!%p691_p9) }
  0x23   : > { %s3338_s8 = scalar_select %p766_p10, %s3309_s6, 1  ;;  %vm785_vm0 = vcmask 261120   ;;  %v3035_v21 = vld [vmem:[%s3775_s12 + $0x8] sm:$0xff]   ;;  %v3036_v22 = vld [vmem:[%s3775_s12 + $0x38] sm:$0xff]   ;;  %v3159_v23 = vmov 0.0   ;;  %v3037_v24 = vld [vmem:[%s3775_s12] sm:$0xff]  }
  0x24   : > { %2797 = vmatprep.subr.bf16.mxu0 %v3159_v23  ;;  %2821 = vmatprep.subr.bf16.mxu1 %v3159_v23  ;;  %v3038_v25 = vld [vmem:[%s3775_s12 + $0x30] sm:$0xff]   ;;  %vm3160_vm1 = vmmov 0   ;;  %v3039_v44 = vld [vmem:[%s3775_s12 + $0x18] sm:$0xff]   ;;  %v3043_v52 = vld [vmem:[%s3775_s12 + $0x28] sm:$0xff]   ;;  %vm1661_vm2 = vcmask 64512   ;;  %vm1893_vm3 = vcmask 1043456  }
  0x25   : > { %s2635_s4 = sshll.u32 %s3338_s8, 3  ;;  %2798 = vmatpush3.bf16.msra.mxu0 %v3035_v21  ;;  %2822 = vmatpush3.bf16.msra.mxu1 %v3036_v22  ;;  %v3040_v45 = vld [vmem:[%s3777_s14 + $0x18] sm:$0xff]   ;;  %v3041_v49 = vld [vmem:[%s3775_s12 + $0x10] sm:$0xff]   ;;  %v3045_v56 = vld [vmem:[%s3775_s12 + $0x20] sm:$0xff]   ;;  %s3826_s30 = sld [smem:[#allocation21_spill]] }
  0x26   : > { %s769_s7 = scalar_lea.vmem %s3816_s0, %s2635_s4  ;;  %s773_s25 = scalar_lea.vmem %s3817_s29, %s2635_s4  ;;  %2799 = vmatprep.subr.bf16.mxu0 %v3159_v23  ;;  %2823 = vmatprep.subr.bf16.mxu1 %v3159_v23  ;;  %v2638_v36 = vld [vmem:[%s3819_s2] ss:$0 sm:$0xff]  ;;  %v3042_v50 = vld [vmem:[%s3777_s14 + $0x10] sm:$0xff]   ;;  %v3044_v53 = vld [vmem:[%s3777_s14 + $0x38] sm:$0xff]  }
  0x27   : > { %v3347_v0 = vld [vmem:[%s769_s7] sm:$0xff]  ;;  %s777_s3 = scalar_lea.vmem %s3818_s24, %s2635_s4  ;;  %2801 = vmatprep.mubr.msk.bf16.mxu0 %vm3160_vm1, %v3159_v23  ;;  %2825 = vmatprep.mubr.msk.bf16.mxu1 %vm3160_vm1, %v3159_v23  ;;  %s3820_s24 = sld [smem:[#allocation17_spill]]  ;;  %v3046_v57 = vld [vmem:[%s3777_s14 + $0x30] sm:$0xff]   ;;  %v3047_v60 = vld [vmem:[%s3777_s14 + $0x8] sm:$0xff]  }
  0x28   : > { %v815_v1 = vld [vmem:[%s773_s25] sm:$0xff]  ;;  %v786_v2 = vsel %vm785_vm0, %v3347_v0, 0.0  ;;  %s3822_s2 = sld [smem:[#allocation19_spill]]  ;;  %v3052_v61 = vld [vmem:[%s3779_s16 + $0x18] sm:$0xff]   ;;  %s3162_s4 = smov [#allocation2]  }
  0x29   : > { %v846_v3 = vld [vmem:[%s777_s3] sm:$0xff]  ;;  %787 = vadd.xlane.f32.xlu0 %v786_v2  ;;  %v818_v4 = vsel %vm785_vm0, %v815_v1, 0.0  ;;  %2800 = vmatpush3.bf16.msra.mxu0 %v3037_v24  ;;  %s3823_s7 = sld [smem:[#allocation20_spill]]  ;;  %v3054_v2 = vld [vmem:[%s3779_s16 + $0x10] sm:$0xff]  }
  0x2a   : > { %v849_v5 = vsel %vm785_vm0, %v846_v3, 0.0  ;;  %2824 = vmatpush3.bf16.msra.mxu1 %v3038_v25  ;;  %2805 = vmatprep.subr.bf16.mxu0 %v3159_v23  ;;  %v2640_v41 = vld [vmem:[%s3821_s28] ss:$0 sm:$0xff]  ;;  %v2661_v21 = vld [vmem:[%s3778_s15 + $0x1] ss:$0 sm:$0xff] }
  0x2b   : > { %2837 = vmatprep.subr.bf16.mxu1 %v3159_v23  ;;  %v2643_v63 = vld [vmem:[%s3772_s9] ss:$0 sm:$0xff] }
  0x2d   : > { %819 = vadd.xlane.f32.xlu0 %v818_v4  ;;  %v2639_v38 = vld [vmem:[%s3820_s24] ss:$0 sm:$0xff]  ;;  %v3049_v4 = vld [vmem:[%s3777_s14 + $0x28] sm:$0xff]   ;;  %s2722_s24 = sshll.u32 %s3309_s6, 7 }
  0x2e   : > { %v2641_v48 = vld [vmem:[%s3822_s2] ss:$0 sm:$0xff]  ;;  %s780_s2 = scalar_lea.vmem %s3824_s1, %s3338_s8  ;;  %s763_s1 = sand.u32 1, %s3149_s26  }
  0x2f   : > { %v2642_v59 = vld [vmem:[%s3823_s7] ss:$0 sm:$0xff]  ;;  %s3721_s3 = scalar_lea.hbm %s3826_s30, %s2722_s24  ;;  %s2525_s6 = scalar_lea.sflag [#allocation3], %s763_s1 }
  0x31   : > { %850 = vadd.xlane.f32.xlu0 %v849_v5 }
  0xb2   : > { %v788_v6 = vpop.xlane.xlu0 %787 }
  0xb3   : > { %v790_v7 = vmul.f32 0.03125, %v788_v6  ;;  %v3056_v6 = vld [vmem:[%s3779_s16 + $0x38] sm:$0xff]  }
  0xb5   : > { %v791_v8 = vsub.f32 %v3347_v0, %v790_v7  ;;  %v3050_v7 = vld [vmem:[%s3777_s14 + $0x20] sm:$0xff]  }
  0xb6   : > { %v820_v9 = vpop.xlane.xlu0 %819 }
  0xb7   : > { %v821_v10 = vmul.f32 0.03125, %v820_v9  ;;  %v792_v11 = vmul.f32 %v791_v8, %v791_v8  ;;  %v3051_v9 = vld [vmem:[%s3779_s16 + $0x8] sm:$0xff]  }
  0xb9   : > { %v822_v12 = vsub.f32 %v815_v1, %v821_v10  ;;  %v793_v13 = vsel %vm785_vm0, %v792_v11, 0.0  ;;  %v3048_v1 = vld [vmem:[%s3777_s14] sm:$0xff]   ;;  %v3055_v11 = vld [vmem:[%s3779_s16 + $0x28] sm:$0xff]  }
  0xba   : > { %794 = vadd.xlane.f32.xlu1 %v793_v13  ;;  %v851_v14 = vpop.xlane.xlu0 %850  ;;  %v3053_v10 = vld [vmem:[%s3779_s16] sm:$0xff]  }
  0xbb   : > { %v823_v15 = vmul.f32 %v822_v12, %v822_v12  ;;  %v852_v16 = vmul.f32 0.03125, %v851_v14 }
  0xbd   : > { %v824_v17 = vsel %vm785_vm0, %v823_v15, 0.0  ;;  %v3359_v18 = vsub.f32 %v846_v3, %v852_v16 }
  0xbe   : > { %825 = vadd.xlane.f32.xlu1 %v824_v17 }
  0xbf   : > { %v854_v19 = vmul.f32 %v3359_v18, %v3359_v18 }
  0xc1   : > { %v855_v20 = vsel %vm785_vm0, %v854_v19, 0.0 }
  0xc2   : > { %856 = vadd.xlane.f32.xlu1 %v855_v20 }
 0x143   : > { %v795_v26 = vpop.xlane.xlu1 %794 }
 0x144   : > { %v796_v27 = vmul.f32 0.03125, %v795_v26 }
 0x146   : > { %v797_v28 = vadd.f32 1e-05, %v796_v27 }
 0x147   : > { %v826_v29 = vpop.xlane.xlu1 %825 }
 0x148   : > { %3069 = vrsqrt.f32 %v797_v28  ;;  %v827_v30 = vmul.f32 0.03125, %v826_v29  ;;  %v2645_v29 = vld [vmem:[%s3776_s13 + $0x1] ss:$0 sm:$0xff] }
 0x14a   : > { %v828_v31 = vadd.f32 1e-05, %v827_v30 }
 0x14b   : > { %v857_v32 = vpop.xlane.xlu1 %856 }
 0x14c   : > { %3071 = vrsqrt.f32 %v828_v31  ;;  %v858_v33 = vmul.f32 0.03125, %v857_v32 }
 0x14e   : > { %v859_v34 = vadd.f32 1e-05, %v858_v33 }
 0x150   : > { %3073 = vrsqrt.f32 %v859_v34 }
 0x155   : > { %v3070_v35 = vpop.eup %3069 }
 0x156   : > { %v799_v37 = vmul.f32 %v3070_v35, %v791_v8  ;;  %v3058_v8 = vld [vmem:[%s3779_s16 + $0x30] sm:$0xff]   ;;  %v2663_v35 = vld [vmem:[%s3778_s15 + $0x3] ss:$0 sm:$0xff] }
 0x158   : > { %v806_v39 = vmul.f32 %v2638_v36, %v799_v37 }
 0x159   : > { %v3072_v40 = vpop.eup %3071 }
 0x15a   : > { %v830_v42 = vmul.f32 %v3072_v40, %v822_v12  ;;  %v813_v43 = vadd.f32 %v2639_v38, %v806_v39  ;;  %v3057_v12 = vld [vmem:[%s3779_s16 + $0x20] sm:$0xff]  }
 0x15c   : > { %v814_v46 = vpack.c.bf16 %v813_v43, %v813_v43  ;;  %v837_v47 = vmul.f32 %v2640_v41, %v830_v42 }
 0x15d   : > { %v3074_v55 = vpop.eup %3073 }
 0x15e   : > { %2802 = vmatmul.mubr.msk.bf16.vlgmr.msra.gmra.mxu0 %vm785_vm0, %v814_v46  ;;  %2826 = vmatmul.mubr.msk.bf16.vlgmr.msra.gmra.mxu1 %vm785_vm0, %v814_v46  ;;  %v844_v51 = vadd.f32 %v2641_v48, %v837_v47  ;;  %v861_v58 = vmul.f32 %v3074_v55, %v3359_v18 }
 0x15f   : > { %2806 = vmatpush3.bf16.msra.mxu0 %v3039_v44  ;;  %2838 = vmatpush3.bf16.msra.mxu1 %v3040_v45  ;;  %v2647_v44 = vld [vmem:[%s3776_s13 + $0x3] ss:$0 sm:$0xff] }
 0x160   : > { %2807 = vmatprep.subr.bf16.mxu0 %v3159_v23  ;;  %2839 = vmatprep.subr.bf16.mxu1 %v3159_v23  ;;  %v845_v54 = vpack.c.bf16 %v844_v51, %v844_v51  ;;  %v868_v62 = vmul.f32 %v2642_v59, %v861_v58 }
 0x161   : > { %2809 = vmatprep.mubr.msk.bf16.mxu0 %vm3160_vm1, %v3159_v23  ;;  %2841 = vmatprep.mubr.msk.bf16.mxu1 %vm3160_vm1, %v3159_v23 }
 0x162   : > { %v875_v3 = vadd.f32 %v2643_v63, %v868_v62 }
 0x163   : > { %2808 = vmatpush3.bf16.msra.mxu0 %v3041_v49  ;;  %2840 = vmatpush3.bf16.msra.mxu1 %v3042_v50  ;;  %v2660_v50 = vld [vmem:[%s3778_s15] ss:$0 sm:$0xff] }
 0x164   : > { %2813 = vmatprep.subr.bf16.mxu0 %v3159_v23  ;;  %2853 = vmatprep.subr.bf16.mxu1 %v3159_v23  ;;  %v876_v5 = vpack.c.bf16 %v875_v3, %v875_v3  ;;  %v2662_v3 = vld [vmem:[%s3778_s15 + $0x2] ss:$0 sm:$0xff] }
 0x166   : > { %2810 = vmatmul.mubr.msk.bf16.vlgmr.msra.gmra.mxu0 %vm785_vm0, %v814_v46  ;;  %2842 = vmatmul.mubr.msk.bf16.vlgmr.msra.gmra.mxu1 %vm785_vm0, %v845_v54 }
 0x167   : > { %2814 = vmatpush3.bf16.msra.mxu0 %v3043_v52  ;;  %2854 = vmatpush3.bf16.msra.mxu1 %v3044_v53  ;;  %v2677_v53 = vld [vmem:[%s3780_s17 + $0x1] ss:$0 sm:$0xff] }
 0x168   : > { %2815 = vmatprep.subr.bf16.mxu0 %v3159_v23  ;;  %2855 = vmatprep.subr.bf16.mxu1 %v3159_v23 }
 0x169   : > { %2817 = vmatprep.mubr.msk.bf16.mxu0 %vm3160_vm1, %v3159_v23  ;;  %2857 = vmatprep.mubr.msk.bf16.mxu1 %vm3160_vm1, %v3159_v23 }
 0x16b   : > { %2816 = vmatpush3.bf16.msra.mxu0 %v3045_v56  ;;  %2856 = vmatpush3.bf16.msra.mxu1 %v3046_v57 }
 0x16c   : > { %2829 = vmatprep.subr.bf16.mxu0 %v3159_v23  ;;  %2869 = vmatprep.subr.bf16.mxu1 %v3159_v23 }
 0x16e   : > { %2818 = vmatmul.mubr.msk.bf16.vlgmr.msra.gmra.mxu0 %vm785_vm0, %v814_v46  ;;  %2858 = vmatmul.mubr.msk.bf16.vlgmr.msra.gmra.mxu1 %vm785_vm0, %v845_v54 }
 0x16f   : > { %2830 = vmatpush3.bf16.msra.mxu0 %v3047_v60  ;;  %2833 = vmatprep.mubr.msk.bf16.mxu0 %vm3160_vm1, %v3159_v23  ;;  %v2644_v60 = vld [vmem:[%s3776_s13] ss:$0 sm:$0xff] }
 0x170   : > { %2831 = vmatprep.subr.bf16.mxu0 %v3159_v23  ;;  %2870 = vmatpush3.bf16.msra.mxu1 %v3052_v61 }
 0x171   : > { %2871 = vmatprep.subr.bf16.mxu1 %v3159_v23  ;;  %2873 = vmatprep.mubr.msk.bf16.mxu1 %vm3160_vm1, %v3159_v23 }
 0x173   : > { %2832 = vmatpush3.bf16.msra.mxu0 %v3048_v1 }
 0x174   : > { %2845 = vmatprep.subr.bf16.mxu0 %v3159_v23  ;;  %2872 = vmatpush3.bf16.msra.mxu1 %v3054_v2 }
 0x175   : > { %2885 = vmatprep.subr.bf16.mxu1 %v3159_v23 }
 0x176   : > { %2834 = vmatmul.mubr.msk.bf16.vlgmr.msra.gmra.mxu0 %vm785_vm0, %v845_v54 }
 0x177   : > { %2846 = vmatpush3.bf16.msra.mxu0 %v3049_v4  ;;  %2849 = vmatprep.mubr.msk.bf16.mxu0 %vm3160_vm1, %v3159_v23 }
 0x178   : > { %2847 = vmatprep.subr.bf16.mxu0 %v3159_v23  ;;  %2874 = vmatmul.mubr.msk.bf16.vlgmr.msra.gmra.mxu1 %vm785_vm0, %v876_v5 }
 0x179   : > { %2886 = vmatpush3.bf16.msra.mxu1 %v3056_v6  ;;  %2889 = vmatprep.mubr.msk.bf16.mxu1 %vm3160_vm1, %v3159_v23 }
 0x17a   : > { %2887 = vmatprep.subr.bf16.mxu1 %v3159_v23 }
 0x17b   : > { %2848 = vmatpush3.bf16.msra.mxu0 %v3050_v7 }
 0x17c   : > { %2861 = vmatprep.subr.bf16.mxu0 %v3159_v23 }
 0x17d   : > { %2888 = vmatpush3.bf16.msra.mxu1 %v3058_v8 }
 0x17e   : > { %2850 = vmatmul.mubr.msk.bf16.vlgmr.msra.gmra.mxu0 %vm785_vm0, %v845_v54  ;;  %2899 = vmatprep.subr.bf16.mxu1 %v3159_v23 }
 0x17f   : > { %2862 = vmatpush3.bf16.msra.mxu0 %v3051_v9  ;;  %2865 = vmatprep.mubr.msk.bf16.mxu0 %vm3160_vm1, %v3159_v23 }
 0x180   : > { %2863 = vmatprep.subr.bf16.mxu0 %v3159_v23  ;;  %2890 = vmatmul.mubr.msk.bf16.vlgmr.msra.gmra.mxu1 %vm785_vm0, %v876_v5 }
 0x181   : > { %2901 = vmatprep.mubr.msk.bf16.mxu1 %vm3160_vm1, %v3159_v23 }
 0x183   : > { %2864 = vmatpush3.bf16.msra.mxu0 %v3053_v10 }
 0x184   : > { %2877 = vmatprep.subr.bf16.mxu0 %v3159_v23 }
 0x186   : > { %2866 = vmatmul.mubr.msk.bf16.vlgmr.msra.gmra.mxu0 %vm785_vm0, %v876_v5 }
 0x187   : > { %2878 = vmatpush3.bf16.msra.mxu0 %v3055_v11  ;;  %2881 = vmatprep.mubr.msk.bf16.mxu0 %vm3160_vm1, %v3159_v23 }
 0x188   : > { %2879 = vmatprep.subr.bf16.mxu0 %v3159_v23 }
 0x18b   : > { %2880 = vmatpush3.bf16.msra.mxu0 %v3057_v12 }
 0x18c   : > { %2893 = vmatprep.subr.bf16.mxu0 %v3159_v23 }
 0x18e   : > { %2882 = vmatmul.mubr.msk.bf16.vlgmr.msra.gmra.mxu0 %vm785_vm0, %v876_v5 }
 0x18f   : > { %2895 = vmatprep.mubr.msk.bf16.mxu0 %vm3160_vm1, %v3159_v23 }
 0x21e   : > { %v3521_v13 = vpop.f32.mrf.mxu0  ;;  %v1126_v14 = vpop.f32.mrf.mxu1 }
 0x21f   : > { %v1127_v51 = vadd.f32 %v2647_v44, %v1126_v14  ;;  %v971_v5 = vadd.f32 %v2644_v60, %v3521_v13 }
 0x220   : > { %v2803_v15 = vpop.f32.mrf.mxu0  ;;  %v2827_v16 = vpop.f32.mrf.mxu1 }
 0x221   : > { %v1649_v57 = vpack.c.bf16 %v1127_v51, %v1127_v51  ;;  %v1646_v12 = vpack.c.bf16 %v971_v5, %v971_v5  ;;  %v2646_v15 = vld [vmem:[%s3776_s13 + $0x2] ss:$0 sm:$0xff] }
 0x222   : > { %v973_v17 = vpop.f32.mrf.mxu0  ;;  %v1129_v18 = vpop.f32.mrf.mxu1 }
 0x224   : > { %v2804_v19 = vpop.f32.mrf.mxu0  ;;  %v2828_v20 = vpop.f32.mrf.mxu1 }
 0x225   : > { %v2676_v19 = vld [vmem:[%s3780_s17] ss:$0 sm:$0xff] }
 0x226   : > { %v1022_v22 = vpop.f32.mrf.mxu0  ;;  %v1277_v24 = vpop.f32.mrf.mxu1 }
 0x227   : > { %v1278_v25 = vadd.f32 %v2661_v21, %v1277_v24  ;;  %v1023_v36 = vadd.f32 %v2645_v29, %v1022_v22 }
 0x228   : > { %v2811_v26 = vpop.f32.mrf.mxu0  ;;  %v2843_v27 = vpop.f32.mrf.mxu1 }
 0x229   : > { %v1651_v28 = vpack.c.bf16 %v1278_v25, %v1278_v25  ;;  %v1647_v42 = vpack.c.bf16 %v1023_v36, %v1023_v36  ;;  %v2692_v36 = vld [vmem:[%s780_s2] ss:$0 sm:$0xff]  ;;  %s2634_s2 = sshll.u32 %s763_s1, 3 }
 0x22a   : > { %v1025_v30 = vpop.f32.mrf.mxu0  ;;  %v1280_v31 = vpop.f32.mrf.mxu1  ;;  %s765_s5 = scalar_lea.vmem [#allocation2], %s2634_s2  ;;  %s3101_s2 = sshll.u32 %s3162_s4, 4  ;;  %s3102_s2 = int_to_ptr.vmem [resolvable:$false] %s3101_s2 }
 0x22b   : > { %v1712_v32 = vsel %vm1661_vm2, %v1651_v28, 0  ;;  %s2538_s27 = sshll.u32 %s765_s5, 4  ;;  %s3103_s8 = scalar_lea.vmem %s3102_s2, 256  ;;  %s3723_s27 = int_to_ptr.vmem [resolvable:$true] %s2538_s27 }
 0x22c   : > { %v2812_v33 = vpop.f32.mrf.mxu0  ;;  %v2844_v34 = vpop.f32.mrf.mxu1  ;;  %2900 = vmatpush3.bf16.xpose.msra.mxu1 %v1712_v32  ;;  %s3097_s25 = scalar_lea.vmem %s3723_s27, 128  ;;  %p3104_p0 = scmp.lt.s32.totalorder %s3723_s27, %s3102_s2 }
 0x22d   : > { %2911 = vmatprep.subr.bf16.mxu1 %v3159_v23  ;;  %p3098_p11 = scmp.ne.s32.totalorder %s3723_s27, %s3097_s25  ;;  %p3105_p1 = scmp.lt.s32.totalorder %s3103_s8, %s3097_s25 }
 0x22e   : > { %v1074_v37 = vpop.f32.mrf.mxu0  ;;  %v1381_v38 = vpop.f32.mrf.mxu1 }
 0x22f   : > { %v1382_v39 = vadd.f32 %v2663_v35, %v1381_v38  ;;  %v1075_v21 = vadd.f32 %v2646_v15, %v1074_v37  ;;  %p3099_p12 = pnand %p3098_p11, %p3326_p5  ;;  %p3106_p2 = por %p3105_p1, %p3104_p0 }
 0x230   : > { %v2819_v40 = vpop.f32.mrf.mxu0  ;;  %v2859_v41 = vpop.f32.mrf.mxu1 }
 0x231   : > { %v1653_v43 = vpack.c.bf16 %v1382_v39, %v1382_v39  ;;  %v1648_v27 = vpack.c.bf16 %v1075_v21, %v1075_v21  ;;  %p3100_p13 = pneg %p3099_p12 }
 0x232   : > { %v1077_v45 = vpop.f32.mrf.mxu0  ;;  %v1384_v46 = vpop.f32.mrf.mxu1 }
 0x233   : > { %v1804_v47 = vsel %vm1661_vm2, %v1653_v43, 0  ;;  %2902 = vmatmul.mubr.msk.bf16.vlgmr.msra.gmra.mxu1 %vm1661_vm2, %v1647_v42  ;;  %p3107_p3 = pnand %p3106_p2, %p3100_p13 }
 0x234   : > { %v2820_v48 = vpop.f32.mrf.mxu0  ;;  %v2860_v49 = vpop.f32.mrf.mxu1  ;;  %2912 = vmatpush3.bf16.xpose.msra.mxu1 %v1804_v47  ;;  %2913 = vmatprep.mubr.msk.bf16.mxu1 %vm3160_vm1, %v3159_v23 }
 0x235   : > { %2923 = vmatprep.subr.bf16.mxu1 %v3159_v23 }
 0x236   : > { %v1225_v52 = vpop.f32.mrf.mxu0 }
 0x237   : > { %v1226_v54 = vadd.f32 %v2660_v50, %v1225_v52 }
 0x238   : > { %v2835_v55 = vpop.f32.mrf.mxu0  ;;  %v1532_v56 = vpop.f32.mrf.mxu1 }
 0x239   : > { %v1650_v58 = vpack.c.bf16 %v1226_v54, %v1226_v54  ;;  %v1533_v59 = vadd.f32 %v2677_v53, %v1532_v56 }
 0x23a   : > { %v1228_v61 = vpop.f32.mrf.mxu0  ;;  %v2875_v62 = vpop.f32.mrf.mxu1 }
 0x23b   : > { %v1666_v63 = vsel %vm1661_vm2, %v1650_v58, 0  ;;  %2914 = vmatmul.mubr.msk.bf16.vlgmr.msra.gmra.mxu1 %vm1661_vm2, %v1649_v57  ;;  %v1643_v1 = vpack.c.bf16 %v1533_v59, %v1533_v59 }
 0x23c   : > { %v2836_v2 = vpop.f32.mrf.mxu0  ;;  %2894 = vmatpush3.bf16.xpose.msra.mxu0 %v1666_v63  ;;  %v1535_v4 = vpop.f32.mrf.mxu1  ;;  %2925 = vmatprep.mubr.msk.bf16.mxu1 %vm3160_vm1, %v3159_v23 }
 0x23d   : > { %2905 = vmatprep.subr.bf16.mxu0 %v3159_v23  ;;  %v1941_v6 = vsel %vm1893_vm3, %v1643_v1, 0 }
 0x23e   : > { %v1329_v7 = vpop.f32.mrf.mxu0  ;;  %v2876_v8 = vpop.f32.mrf.mxu1  ;;  %2924 = vmatpush3.bf16.msra.mxu1 %v1941_v6 }
 0x23f   : > { %v1330_v9 = vadd.f32 %v2662_v3, %v1329_v7  ;;  %2935 = vmatprep.subr.bf16.mxu1 %v3159_v23  ;;  %v2679_v3 = vld [vmem:[%s3780_s17 + $0x3] ss:$0 sm:$0xff] }
 0x240   : > { %v2851_v10 = vpop.f32.mrf.mxu0  ;;  %v3562_v11 = vpop.f32.mrf.mxu1 }
 0x241   : > { %v1652_v14 = vpack.c.bf16 %v1330_v9, %v1330_v9  ;;  %v1637_v5 = vadd.f32 %v2679_v3, %v3562_v11 }
 0x242   : > { %v1332_v13 = vpop.f32.mrf.mxu0  ;;  %v2891_v16 = vpop.f32.mrf.mxu1 }
 0x243   : > { %v1758_v17 = vsel %vm1661_vm2, %v1652_v14, 0  ;;  %2896 = vmatmul.mubr.msk.bf16.vlgmr.msra.gmra.mxu0 %vm1661_vm2, %v1646_v12  ;;  %v1645_v7 = vpack.c.bf16 %v1637_v5, %v1637_v5 }
 0x244   : > { %v2852_v18 = vpop.f32.mrf.mxu0  ;;  %2906 = vmatpush3.bf16.xpose.msra.mxu0 %v1758_v17  ;;  %2907 = vmatprep.mubr.msk.bf16.mxu0 %vm3160_vm1, %v3159_v23  ;;  %v1639_v20 = vpop.f32.mrf.mxu1  ;;  %v2678_v17 = vld [vmem:[%s3780_s17 + $0x2] ss:$0 sm:$0xff] }
 0x245   : > { %2917 = vmatprep.subr.bf16.mxu0 %v3159_v23  ;;  %v2033_v15 = vsel %vm1893_vm3, %v1645_v7, 0 }
 0x246   : > { %v1480_v22 = vpop.f32.mrf.mxu0  ;;  %v2892_v24 = vpop.f32.mrf.mxu1 }
 0x247   : > { %v1481_v25 = vadd.f32 %v2676_v19, %v1480_v22 }
 0x248   : > { %v2867_v26 = vpop.f32.mrf.mxu0 }
 0x249   : > { %v1642_v28 = vpack.c.bf16 %v1481_v25, %v1481_v25 }
 0x24a   : > { %v1483_v29 = vpop.f32.mrf.mxu0 }
 0x24b   : > { %v1895_v30 = vsel %vm1893_vm3, %v1642_v28, 0  ;;  %2908 = vmatmul.mubr.msk.bf16.vlgmr.msra.gmra.mxu0 %vm1661_vm2, %v1648_v27 }
 0x24c   : > { %v2868_v31 = vpop.f32.mrf.mxu0  ;;  %2918 = vmatpush3.bf16.msra.mxu0 %v1895_v30  ;;  %2919 = vmatprep.mubr.msk.bf16.mxu0 %vm3160_vm1, %v3159_v23 }
 0x24d   : > { %2929 = vmatprep.subr.bf16.mxu0 %v3159_v23  ;;  %v2084_v31 = vld [vmem:[%s3781_s18 + $0x4] sm:$0xf] }
 0x24e   : > { %v3580_v32 = vpop.f32.mrf.mxu0 }
 0x24f   : > { %v1585_v21 = vadd.f32 %v2678_v17, %v3580_v32  ;;  %v2137_v32 = vsel %vm1893_vm3, %v2084_v31, 0 }
 0x250   : > { %v2883_v33 = vpop.f32.mrf.mxu0 }
 0x251   : > { %v1644_v22 = vpack.c.bf16 %v1585_v21, %v1585_v21  ;;  %v2083_v33 = vld [vmem:[%s3781_s18] sm:$0xf] }
 0x252   : > { %v1587_v34 = vpop.f32.mrf.mxu0 }
 0x253   : > { %v1987_v27 = vsel %vm1893_vm3, %v1644_v22, 0  ;;  %v2091_v34 = vsel %vm1893_vm3, %v2083_v33, 0 }
 0x254   : > { %v2884_v35 = vpop.f32.mrf.mxu0 }
 0x2f3   : > { %v1748_v37 = vpop.f32.mrf.mxu1 }
 0x2f4   : > { %v1749_v38 = vadd.f32 %v2692_v36, %v1748_v37 }
 0x2f5   : > { %v2903_v39 = vpop.f32.mrf.mxu1 }
 0x2f6   : > { %v1849_v40 = vsel %vm1661_vm2, %v1749_v38, -inf }
 0x2f7   : > { %1850 = vmax.xlane.f32.xlu1 %v1849_v40  ;;  %v1751_v41 = vpop.f32.mrf.mxu1  ;;  %v2086_v40 = vld [vmem:[%s3781_s18 + $0xc] sm:$0xf] }
 0x2f9   : > { %v2904_v42 = vpop.f32.mrf.mxu1 }
 0x2fb   : > { %v1840_v43 = vpop.f32.mrf.mxu1 }
 0x2fc   : > { %v1841_v44 = vadd.f32 %v2692_v36, %v1840_v43 }
 0x2fd   : > { %v2915_v45 = vpop.f32.mrf.mxu1 }
 0x2fe   : > { %v1855_v46 = vsel %vm1661_vm2, %v1841_v44, -inf }
 0x2ff   : > { %1856 = vmax.xlane.f32.xlu1 %v1855_v46  ;;  %v1843_v47 = vpop.f32.mrf.mxu1 }
 0x301   : > { %v2916_v48 = vpop.f32.mrf.mxu1 }
 0x303   : > { %v1702_v49 = vpop.f32.mrf.mxu0 }
 0x304   : > { %v1703_v50 = vadd.f32 %v2692_v36, %v1702_v49 }
 0x305   : > { %v2897_v51 = vpop.f32.mrf.mxu0 }
 0x306   : > { %v1846_v52 = vsel %vm1661_vm2, %v1703_v50, -inf }
 0x307   : > { %1847 = vmax.xlane.f32.xlu0 %v1846_v52  ;;  %v1705_v53 = vpop.f32.mrf.mxu0 }
 0x309   : > { %v2898_v54 = vpop.f32.mrf.mxu0 }
 0x30b   : > { %v1794_v55 = vpop.f32.mrf.mxu0 }
 0x30c   : > { %v1795_v56 = vadd.f32 %v2692_v36, %v1794_v55 }
 0x30d   : > { %v2909_v57 = vpop.f32.mrf.mxu0 }
 0x30e   : > { %v1852_v58 = vsel %vm1661_vm2, %v1795_v56, -inf  ;;  %v2085_v57 = vld [vmem:[%s3781_s18 + $0x8] sm:$0xf] }
 0x30f   : > { %1853 = vmax.xlane.f32.xlu0 %v1852_v58  ;;  %v1797_v59 = vpop.f32.mrf.mxu0 }
 0x311   : > { %v2910_v60 = vpop.f32.mrf.mxu0 }
 0x380   : > { %v1851_v61 = vpop.xlane.xlu1 %1850 }
 0x381   : > { %v1859_v62 = vsub.f32 %v1749_v38, %v1851_v61  ;;  %v2183_v61 = vsel %vm1893_vm3, %v2085_v57, 0  ;;  %v3066_v57 = vld [vmem:[%s3785_s22 + $0x10] sm:$0xff]  }
 0x383   : > { %v1864_v63 = vmul.f32 1.442695, %v1859_v62 }
 0x385   : > { %3075 = vpow2.f32 %v1864_v63 }
 0x388   : > { %v1857_v1 = vpop.xlane.xlu1 %1856 }
 0x389   : > { %v1861_v2 = vsub.f32 %v1841_v44, %v1857_v1  ;;  %v2229_v44 = vsel %vm1893_vm3, %v2086_v40, 0 }
 0x38b   : > { %v1868_v4 = vmul.f32 1.442695, %v1861_v2 }
 0x38d   : > { %3077 = vpow2.f32 %v1868_v4 }
 0x390   : > { %v1848_v6 = vpop.xlane.xlu0 %1847 }
 0x391   : > { %v1858_v8 = vsub.f32 %v1703_v50, %v1848_v6 }
 0x392   : > { %v3076_v9 = vpop.eup %3075 }
 0x393   : > { %v1862_v10 = vmul.f32 1.442695, %v1858_v8  ;;  %v1873_v12 = vsel %vm1661_vm2, %v3076_v9, 0.0  ;;  %v1887_v14 = vpack.c.bf16 %v3076_v9, %v3076_v9 }
 0x394   : > { %1874 = vadd.xlane.f32.xlu1 %v1873_v12 }
 0x395   : > { %3079 = vpow2.f32 %v1862_v10  ;;  %2926 = vmatmul.mubr.msk.bf16.vlgmr.msra.gmra.mxu1 %vm1661_vm2, %v1887_v14 }
 0x396   : > { %2936 = vmatpush3.bf16.msra.mxu1 %v2033_v15  ;;  %2937 = vmatprep.mubr.msk.bf16.mxu1 %vm3160_vm1, %v3159_v23 }
 0x397   : > { %2947 = vmatprep.subr.bf16.mxu1 %v3159_v23 }
 0x398   : > { %v1854_v11 = vpop.xlane.xlu0 %1853 }
 0x399   : > { %v1860_v13 = vsub.f32 %v1795_v56, %v1854_v11 }
 0x39a   : > { %v3078_v16 = vpop.eup %3077 }
 0x39b   : > { %v1866_v18 = vmul.f32 1.442695, %v1860_v13  ;;  %v1879_v19 = vsel %vm1661_vm2, %v3078_v16, 0.0  ;;  %v1889_v20 = vpack.c.bf16 %v3078_v16, %v3078_v16 }
 0x39c   : > { %1880 = vadd.xlane.f32.xlu1 %v1879_v19 }
 0x39d   : > { %3081 = vpow2.f32 %v1866_v18  ;;  %2938 = vmatmul.mubr.msk.bf16.vlgmr.msra.gmra.mxu1 %vm1661_vm2, %v1889_v20 }
 0x39e   : > { %2949 = vmatprep.mubr.msk.bf16.mxu1 %vm3160_vm1, %v3159_v23  ;;  %2948 = vmatpush3.bf16.msra.mxu1 %v2137_v32 }
 0x39f   : > { %2959 = vmatprep.subr.bf16.mxu1 %v3159_v23 }
 0x3a2   : > { %v3080_v24 = vpop.eup %3079 }
 0x3a3   : > { %v1870_v25 = vsel %vm1661_vm2, %v3080_v24, 0.0  ;;  %v1886_v26 = vpack.c.bf16 %v3080_v24, %v3080_v24 }
 0x3a4   : > { %1871 = vadd.xlane.f32.xlu0 %v1870_v25 }
 0x3a5   : > { %2920 = vmatmul.mubr.msk.bf16.vlgmr.msra.gmra.mxu0 %vm1661_vm2, %v1886_v26 }
 0x3a6   : > { %2930 = vmatpush3.bf16.msra.mxu0 %v1987_v27  ;;  %2931 = vmatprep.mubr.msk.bf16.mxu0 %vm3160_vm1, %v3159_v23 }
 0x3a7   : > { %2941 = vmatprep.subr.bf16.mxu0 %v3159_v23 }
 0x3aa   : > { %v3082_v28 = vpop.eup %3081 }
 0x3ab   : > { %v1876_v29 = vsel %vm1661_vm2, %v3082_v28, 0.0  ;;  %v1888_v30 = vpack.c.bf16 %v3082_v28, %v3082_v28 }
 0x3ac   : > { %1877 = vadd.xlane.f32.xlu0 %v1876_v29  ;;  %v2705_v29 = vld [vmem:[%s3782_s19] ss:$0 sm:$0xff] }
 0x3ad   : > { %2932 = vmatmul.mubr.msk.bf16.vlgmr.msra.gmra.mxu0 %vm1661_vm2, %v1888_v30 }
 0x3ae   : > { %2943 = vmatprep.mubr.msk.bf16.mxu0 %vm3160_vm1, %v3159_v23  ;;  %2942 = vmatpush3.bf16.msra.mxu0 %v2091_v34 }
 0x3af   : > { %2953 = vmatprep.subr.bf16.mxu0 %v3159_v23 }
 0x41d   : > { %v1875_v35 = vpop.xlane.xlu1 %1874 }
 0x41e   : > { %3083 = vrcp.f32 %v1875_v35 }
 0x425   : > { %v1881_v36 = vpop.xlane.xlu1 %1880 }
 0x426   : > { %3085 = vrcp.f32 %v1881_v36 }
 0x42b   : > { %v3084_v37 = vpop.eup %3083 }
 0x42d   : > { %v1872_v38 = vpop.xlane.xlu0 %1871 }
 0x42e   : > { %3087 = vrcp.f32 %v1872_v38 }
 0x433   : > { %v3086_v47 = vpop.eup %3085 }
 0x435   : > { %v1878_v48 = vpop.xlane.xlu0 %1877 }
 0x436   : > { %3089 = vrcp.f32 %v1878_v48  ;;  %v2707_v48 = vld [vmem:[%s3774_s11] ss:$0 sm:$0xff] }
 0x43b   : > { %v3088_v55 = vpop.eup %3087 }
 0x443   : > { %v3090_v1 = vpop.eup %3089 }
 0x455   : > { %v1977_v39 = vpop.f32.mrf.mxu1 }
 0x456   : > { %v2076_v41 = vmul.f32 %v3084_v37, %v1977_v39 }
 0x457   : > { %v2927_v42 = vpop.f32.mrf.mxu1 }
 0x458   : > { %v2080_v43 = vpack.c.bf16 %v2076_v41, %v2076_v41  ;;  %v3059_v41 = vld [vmem:[%s3783_s20 + $0x8] sm:$0xff]  }
 0x459   : > { %v1980_v45 = vpop.f32.mrf.mxu1 }
 0x45a   : > { %2950 = vmatmul.mubr.msk.bf16.vlgmr.msra.gmra.mxu1 %vm1661_vm2, %v2080_v43 }
 0x45b   : > { %v2928_v46 = vpop.f32.mrf.mxu1  ;;  %2960 = vmatpush3.bf16.msra.mxu1 %v2229_v44  ;;  %2961 = vmatprep.mubr.msk.bf16.mxu1 %vm3160_vm1, %v3159_v23 }
 0x45c   : > { %2973 = vmatprep.subr.bf16.mxu1 %v3159_v23  ;;  %v2706_v46 = vld [vmem:[%s3773_s10] ss:$0 sm:$0xff] }
 0x45d   : > { %v2069_v49 = vpop.f32.mrf.mxu1 }
 0x45e   : > { %v2078_v50 = vmul.f32 %v3086_v47, %v2069_v49 }
 0x45f   : > { %v2939_v51 = vpop.f32.mrf.mxu1 }
 0x460   : > { %v2082_v52 = vpack.c.bf16 %v2078_v50, %v2078_v50 }
 0x461   : > { %v2072_v53 = vpop.f32.mrf.mxu1 }
 0x462   : > { %2962 = vmatmul.mubr.msk.bf16.vlgmr.msra.gmra.mxu1 %vm1661_vm2, %v2082_v52  ;;  %v3061_v52 = vld [vmem:[%s3785_s22 + $0x38] sm:$0xff]   ;;  %v3062_v53 = vld [vmem:[%s3785_s22 + $0x30] sm:$0xff]  }
 0x463   : > { %v2940_v54 = vpop.f32.mrf.mxu1  ;;  %2989 = vmatprep.mubr.msk.bf16.mxu1 %vm3160_vm1, %v3159_v23  ;;  %2974 = vmatpush3.bf16.msra.mxu1 %v3061_v52 }
 0x464   : > { %2975 = vmatprep.subr.bf16.mxu1 %v3159_v23  ;;  %v3063_v54 = vld [vmem:[%s3785_s22 + $0x28] sm:$0xff]  }
 0x465   : > { %v1931_v56 = vpop.f32.mrf.mxu0 }
 0x466   : > { %v2075_v58 = vmul.f32 %v3088_v55, %v1931_v56  ;;  %v3064_v55 = vld [vmem:[%s3785_s22 + $0x20] sm:$0xff]   ;;  %v3065_v56 = vld [vmem:[%s3785_s22 + $0x18] sm:$0xff]  }
 0x467   : > { %v2921_v59 = vpop.f32.mrf.mxu0  ;;  %2976 = vmatpush3.bf16.msra.mxu1 %v3062_v53 }
 0x468   : > { %v2079_v60 = vpack.c.bf16 %v2075_v58, %v2075_v58  ;;  %2977 = vmatprep.subr.bf16.mxu1 %v3159_v23  ;;  %v3067_v58 = vld [vmem:[%s3785_s22 + $0x8] sm:$0xff]   ;;  %v3068_v59 = vld [vmem:[%s3785_s22] sm:$0xff]  }
 0x469   : > { %v1934_v62 = vpop.f32.mrf.mxu0 }
 0x46a   : > { %2944 = vmatmul.mubr.msk.bf16.vlgmr.msra.gmra.mxu0 %vm1661_vm2, %v2079_v60  ;;  %v2708_v60 = vld [vmem:[%s3784_s21] ss:$0 sm:$0xff] }
 0x46b   : > { %v2922_v63 = vpop.f32.mrf.mxu0  ;;  %2954 = vmatpush3.bf16.msra.mxu0 %v2183_v61  ;;  %2955 = vmatprep.mubr.msk.bf16.mxu0 %vm3160_vm1, %v3159_v23 }
 0x46c   : > { %2965 = vmatprep.subr.bf16.mxu0 %v3159_v23  ;;  %2978 = vmatpush3.bf16.msra.mxu1 %v3063_v54 }
 0x46d   : > { %v2023_v2 = vpop.f32.mrf.mxu0  ;;  %2979 = vmatprep.subr.bf16.mxu1 %v3159_v23 }
 0x46e   : > { %v2077_v3 = vmul.f32 %v3090_v1, %v2023_v2 }
 0x46f   : > { %v2933_v4 = vpop.f32.mrf.mxu0 }
 0x470   : > { %v2081_v5 = vpack.c.bf16 %v2077_v3, %v2077_v3  ;;  %2980 = vmatpush3.bf16.msra.mxu1 %v3064_v55 }
 0x471   : > { %v2026_v6 = vpop.f32.mrf.mxu0  ;;  %2981 = vmatprep.subr.bf16.mxu1 %v3159_v23 }
 0x472   : > { %2956 = vmatmul.mubr.msk.bf16.vlgmr.msra.gmra.mxu0 %vm1661_vm2, %v2081_v5 }
 0x473   : > { %v2934_v7 = vpop.f32.mrf.mxu0  ;;  %2969 = vmatprep.mubr.msk.bf16.mxu0 %vm3160_vm1, %v3159_v23  ;;  %2966 = vmatpush3.bf16.msra.mxu0 %v3059_v41 }
 0x474   : > { %2967 = vmatprep.subr.bf16.mxu0 %v3159_v23  ;;  %2982 = vmatpush3.bf16.msra.mxu1 %v3065_v56 }
 0x475   : > { %2983 = vmatprep.subr.bf16.mxu1 %v3159_v23 }
 0x478   : > { %2984 = vmatpush3.bf16.msra.mxu1 %v3066_v57 }
 0x479   : > { %2985 = vmatprep.subr.bf16.mxu1 %v3159_v23 }
 0x47c   : > { %2986 = vmatpush3.bf16.msra.mxu1 %v3067_v58 }
 0x47d   : > { %2987 = vmatprep.subr.bf16.mxu1 %v3159_v23 }
 0x480   : > { %2988 = vmatpush3.bf16.msra.mxu1 %v3068_v59 }
 0x51a   : > { %v2173_v8 = vpop.f32.mrf.mxu1 }
 0x51b   : > { %v2272_v21 = vsel %vm785_vm0, %v2173_v8, 0.0 }
 0x51c   : > { %v2951_v9 = vpop.f32.mrf.mxu1 }
 0x51e   : > { %v2176_v10 = vpop.f32.mrf.mxu1 }
 0x520   : > { %v2952_v12 = vpop.f32.mrf.mxu1 }
 0x522   : > { %v2265_v14 = vpop.f32.mrf.mxu1 }
 0x523   : > { %v2276_v28 = vsel %vm785_vm0, %v2265_v14, 0.0 }
 0x524   : > { %v2963_v15 = vpop.f32.mrf.mxu1 }
 0x526   : > { %v2268_v11 = vpop.f32.mrf.mxu1 }
 0x528   : > { %v2964_v13 = vpop.f32.mrf.mxu1 }
 0x52a   : > { %v2127_v16 = vpop.f32.mrf.mxu0 }
 0x52b   : > { %v2271_v19 = vsel %vm785_vm0, %v2127_v16, 0.0 }
 0x52c   : > { %v2945_v17 = vpop.f32.mrf.mxu0  ;;  %v2273_v22 = vadd.f32 %v2272_v21, %v2271_v19 }
 0x52e   : > { %v2130_v18 = vpop.f32.mrf.mxu0 }
 0x530   : > { %v2946_v20 = vpop.f32.mrf.mxu0 }
 0x532   : > { %v2219_v24 = vpop.f32.mrf.mxu0 }
 0x533   : > { %v2274_v25 = vsel %vm785_vm0, %v2219_v24, 0.0 }
 0x534   : > { %v2275_v26 = vadd.f32 %v2274_v25, %v2273_v22  ;;  %v2957_v27 = vpop.f32.mrf.mxu0  ;;  %v3161_v22 = vmov -1.0  }
 0x536   : > { %v2277_v30 = vadd.f32 %v2276_v28, %v2275_v26  ;;  %v2222_v31 = vpop.f32.mrf.mxu0 }
 0x538   : > { %v2285_v32 = vadd.f32 %v2705_v29, %v2277_v30  ;;  %v2958_v33 = vpop.f32.mrf.mxu0  ;;  %v2712_v30 = vld [vmem:[%s3786_s23] ss:$0 sm:$0xff] }
 0x53a   : > { %v3658_v34 = vadd.f32 %v2285_v32, %v3347_v0  ;;  %v3060_v0 = vld [vmem:[%s3783_s20] sm:$0xff]  }
 0x53b   : > { %2968 = vmatpush3.bf16.msra.mxu0 %v3060_v0 }
 0x53c   : > { %v2289_v35 = vsel %vm785_vm0, %v3658_v34, 0.0 }
 0x53d   : > { %2290 = vadd.xlane.f32.xlu0 %v2289_v35 }
 0x5c6   : > { %v2291_v36 = vpop.xlane.xlu0 %2290 }
 0x5c7   : > { %v2292_v37 = vmul.f32 0.03125, %v2291_v36 }
 0x5c9   : > { %v2293_v38 = vsub.f32 %v3658_v34, %v2292_v37 }
 0x5cb   : > { %v2294_v39 = vmul.f32 %v2293_v38, %v2293_v38 }
 0x5cd   : > { %v2295_v40 = vsel %vm785_vm0, %v2294_v39, 0.0 }
 0x5ce   : > { %2296 = vadd.xlane.f32.xlu1 %v2295_v40 }
 0x657   : > { %v2297_v42 = vpop.xlane.xlu1 %2296 }
 0x658   : > { %v2298_v43 = vmul.f32 0.03125, %v2297_v42 }
 0x65a   : > { %v2299_v44 = vadd.f32 1e-05, %v2298_v43 }
 0x65c   : > { %3091 = vrsqrt.f32 %v2299_v44 }
 0x669   : > { %v3092_v45 = vpop.eup %3091 }
 0x66a   : > { %v2301_v47 = vmul.f32 %v3092_v45, %v2293_v38 }
 0x66c   : > { %v2308_v49 = vmul.f32 %v2706_v46, %v2301_v47 }
 0x66e   : > { %v2315_v50 = vadd.f32 %v2707_v48, %v2308_v49 }
 0x670   : > { %v2316_v51 = vpack.c.bf16 %v2315_v50, %v2315_v50 }
 0x672   : > { %2970 = vmatmul.mubr.msk.bf16.vlgmr.msra.gmra.mxu0 %vm785_vm0, %v2316_v51 }
 0x732   : > { %v2377_v61 = vpop.f32.mrf.mxu0 }
 0x733   : > { %v2378_v62 = vadd.f32 %v2708_v60, %v2377_v61 }
 0x734   : > { %v2971_v63 = vpop.f32.mrf.mxu0 }
 0x735   : > { %v2384_v1 = vmul.f32 0.70710677, %v2378_v62  ;;  %v2383_v26 = vmul.f32 0.5, %v2378_v62 }
 0x736   : > { %v2380_v2 = vpop.f32.mrf.mxu0 }
 0x737   : > { %v2387_v3 = vand.u32 2147483647, %v2384_v1  ;;  %vm2385_vm4 = vcmp.ge.f32.partialorder %v2384_v1, 0.0 }
 0x738   : > { %v2972_v4 = vpop.f32.mrf.mxu0  ;;  %v2386_v24 = vsel %vm2385_vm4, 1.0, %v3161_v22 }
 0x739   : > { %v2388_v5 = vmul.f32 0.3275911, %v2387_v3  ;;  %v2401_v23 = vsub.f32 0.0, %v2387_v3 }
 0x73b   : > { %v2389_v6 = vadd.f32 1.0, %v2388_v5  ;;  %v2402_v7 = vmul.f32 %v2401_v23, %v2387_v3 }
 0x73d   : > { %3093 = vrcp.f32 %v2389_v6  ;;  %v2403_v10 = vmul.f32 1.442695, %v2402_v7 }
 0x73f   : > { %3095 = vpow2.f32 %v2403_v10 }
 0x74a   : > { %v3094_v8 = vpop.eup %3093 }
 0x74b   : > { %v2392_v9 = vmul.f32 1.0614054, %v3094_v8 }
 0x74c   : > { %v3096_v19 = vpop.eup %3095 }
 0x74d   : > { %v2393_v12 = vadd.f32 -1.4531521, %v2392_v9 }
 0x74f   : > { %v2394_v14 = vmul.f32 %v3094_v8, %v2393_v12 }
 0x751   : > { %v2395_v15 = vadd.f32 1.4214138, %v2394_v14 }
 0x753   : > { %v2396_v11 = vmul.f32 %v3094_v8, %v2395_v15 }
 0x755   : > { %v2397_v13 = vadd.f32 -0.28449672, %v2396_v11 }
 0x757   : > { %v2398_v16 = vmul.f32 %v3094_v8, %v2397_v13 }
 0x759   : > { %v2399_v17 = vadd.f32 0.2548296, %v2398_v16 }
 0x75b   : > { %v2400_v18 = vmul.f32 %v3094_v8, %v2399_v17 }
 0x75d   : > { %v2405_v20 = vmul.f32 %v3096_v19, %v2400_v18 }
 0x75f   : > { %v2406_v21 = vsub.f32 1.0, %v2405_v20 }
 0x761   : > { %v2407_v25 = vmul.f32 %v2406_v21, %v2386_v24 }
 0x763   : > { %v2408_v27 = vadd.f32 1.0, %v2407_v25 }
 0x765   : > { %v2409_v28 = vmul.f32 %v2408_v27, %v2383_v26 }
 0x767   : > { %v2410_v29 = vpack.c.bf16 %v2409_v28, %v2409_v28 }
 0x769   : > { %2990 = vmatmul.mubr.bf16.vlgmr.msra.gmra.mxu1 %v2410_v29 }
 0x829   : > { %v2516_v31 = vpop.f32.mrf.mxu1 }
 0x82a   : > { %v2517_v32 = vadd.f32 %v2712_v30, %v2516_v31 }
 0x82b   : > { %v2991_v33 = vpop.f32.mrf.mxu1 }
 0x82c   : > { %v2522_v35 = vadd.f32 %v2517_v32, %v3658_v34 }
 0x82d   : > { %v2519_v36 = vpop.f32.mrf.mxu1 }
 0x82e   : > { %2523 = vst.msk [vmem:[%s765_s5] sm:$0xff] %vm785_vm0, %v2522_v35 }
 0x82f   : > { %v2992_v37 = vpop.f32.mrf.mxu1 }
 0x830   : > { %3110 = shalt.err (!%p3107_p3)
}
 0x831   : > { %s3111_s0 = scalar_lea.hbm %s3721_s3, 128  ;;  %s3115_s5 = scalar_lea.hbm %s3826_s30, 256 }
 0x832   : > { %p3112_p4 = scmp.ne.s32.totalorder %s3721_s3, %s3111_s0  ;;  %p3116_p9 = scmp.lt.s32.totalorder %s3721_s3, %s3826_s30 }
 0x833   : > { %p3117_p10 = scmp.lt.s32.totalorder %s3115_s5, %s3111_s0 }
 0x834   : > { %p3113_p7 = pnand %p3112_p4, %p3326_p5 }
 0x835   : > { %p3118_p11 = por %p3117_p10, %p3116_p9 }
 0x836   : > { %p3114_p8 = pneg %p3113_p7 }
 0x838   : > { %p3119_p12 = pnand %p3118_p11, %p3114_p8 }
 0x83a   : > { %3122 = shalt.err (!%p3119_p12)
}
 0x83b   : > { %2993 = dma.vmem_to_hbm [thread:$0]  (%p3326_p5), %s3723_s27, 128, %s3721_s3, %s2525_s6  }
 0x83c PF: > { %s3827_s25 = sld [smem:[#allocation7_spill]] }
 0x83d   : > { %s3828_s4 = sld [smem:[#allocation5_spill]] }
 0x842   : > { %p2999_p13 = scmp.ge.s32.totalorder %s3827_s25, 2 }
 0x843   : > { %s2550_s8 = sand.u32 1, %s3828_s4  }
 0x844   : > { %p2996_p0 = pnand %p2999_p13, %p3330_p6  ;;  %s2551_s1 = scalar_lea.sflag [#allocation3], %s2550_s8 }
 0x846   : > { %p2997_p1 = pneg %p2996_p0 }
 0x848   : > { %3140 = dma.done.wait (%p2997_p1), %s2551_s1, 128  }
 0x849   : > { %3142 = vsyncadd (%p2997_p1), %s2551_s1, 4294967168  ;;  %s3830_s28 = sld [smem:[#allocation8_spill]]  ;;  %s3833_s5 = smov %s3149_s26 }
 0x84a   : > { %s3831_s0 = sld [smem:[#allocation6_spill]] }
 0x84b   : > { %s3832_s27 = sld [smem:[#allocation9_spill]] }
 0x84f   : > { %p34_p2 = scmp.ge.s32.totalorder %s3830_s28, 4  }
 0x850   : > { %s3834_s26 = smov %s3831_s0 }
 0x851   :  { %36 = sbr.rel (!%p34_p2) target bundleno = 14 (0xe), region = 160 }
 0x856   :  { %2556 = vsyncpa [#allocation3], 1 }
 0x857   :  { %2558 = vsyncpa [#allocation3 + $0x1], 1 }

</bundles_post_ra>
